<compile_context>
chip_gen: v7x
topology: tpu7x:2x2x1
jax: 0.10.0
libtpu: 0.0.40
codegen_flags: <defaults>
</compile_context>

<pallas_src>
import functools

import jax
import jax.numpy as jnp
import numpy as np
from jax import lax
from jax.experimental import pallas as pl
from jax.experimental.pallas import tpu as pltpu

SPAD = 128      # lane padding for the state axis
NEG = -1e9      # padding sentinel (never wins a max for realistic scores)
UNROLL = 16     # timesteps unrolled per group (even, multiple of 8)


def _viterbi_kernel(rolls_ref, tll_ref, tllT_ref, d0_ref,        # prefetch + inputs
                    argmax_ref, dout_ref,                        # outputs
                    dscr,                                        # scratch (delta carry)
                    *, seq_len, chunk, unroll, n_groups,
                    full_last, run_tail, ssub, num_chunks):
    c = pl.program_id(0)
    U = unroll

    lane_i = lax.broadcasted_iota(jnp.int32, (ssub, SPAD), 1)     # prev-state lane index
    sub_i = lax.broadcasted_iota(jnp.int32, (ssub, SPAD), 0)      # prev-state sublane index
    diag = lane_i == sub_i                                        # sublane->lane transpose mask
    sub_u = lax.broadcasted_iota(jnp.int32, (U, SPAD), 0)

    def run_group(g, d, *, guarded):
        """Runs U timesteps starting at absolute step c*chunk + g*U.

        `d` is the carried delta as an (ssub, SPAD) tile:
          - before an even step  : delta indexed by prev-state on SUBLANES (bcast over lanes)
          - before an odd step   : delta indexed by prev-state on LANES    (bcast over sublanes)
        (group bases are multiples of U (even), so j parity == absolute-t parity.)
        """
        base = c * chunk + g * U

        # Hoisted: scalar roll reads + emission/transition table rows (independent of delta).
        rows = []
        for j in range(U):
            lbl = rolls_ref[base + j]                             # SMEM scalar
            rows.append(tllT_ref[lbl] if (j % 2 == 0) else tll_ref[lbl])   # (ssub, SPAD)

        idx_buf = jnp.zeros((U, SPAD), jnp.int32)
        for j in range(U):                                        # fully unrolled
            if j % 2 == 0:
                # transposed orientation: rows = prev state (ps), lanes = next state (ns)
                featT = rows[j] + d                               # (trans+ll)[ps,ns] + delta[ps]
                red = jnp.max(featT, axis=0, keepdims=True)       # (1,SPAD)  new delta on lanes
                am_row = jnp.min(jnp.where(featT == red, sub_i, ssub),
                                 axis=0, keepdims=True)           # (1,SPAD)  first-index argmax
                d_new = jnp.broadcast_to(red, (ssub, SPAD))
            else:
                # direct orientation: rows = next state (ns), lanes = prev state (ps)
                feat = rows[j] + d                                # (trans+ll)[ns,ps] + delta[ps]
                red = jnp.max(feat, axis=1, keepdims=True)        # (ssub,1)  new delta on sublanes
                am_c = jnp.min(jnp.where(feat == red, lane_i, SPAD),
                               axis=1, keepdims=True)             # (ssub,1)  first-index argmax
                # argmax needs a sublane->lane transpose, but it is OFF the delta chain
                am_row = jnp.sum(jnp.where(diag, jnp.broadcast_to(am_c, (ssub, SPAD)), 0),
                                 axis=0, keepdims=True)           # (1,SPAD)
                d_new = jnp.broadcast_to(red, (ssub, SPAD))

            if guarded:                                           # only first / tail groups
                t = base + j
                ok = jnp.logical_and(t >= 1, t < seq_len)
                d = jnp.where(ok, d_new, d)
                am_row = jnp.where(ok, am_row, 0)
            else:                                                 # steady state: no selects
                d = d_new

            idx_buf = jnp.where(sub_u == j,
                                jnp.broadcast_to(am_row, (U, SPAD)), idx_buf)

        row0 = pl.multiple_of(g * U, U)                           # tile-aligned store
        argmax_ref[pl.ds(row0, U), :] = idx_buf
        return d

    # ---- chunk 0: init delta and run the peeled (guarded) first group --------------
    @pl.when(c == 0)
    def _():
        init = jnp.broadcast_to(d0_ref[...], (ssub, SPAD))        # delta on lanes (t=0)
        dout_ref[...] = init                                      # insurance init of output
        dscr[...] = run_group(0, init, guarded=True)

    # ---- steady state: unguarded groups ---------------------------------------------
    if num_chunks == 1:
        if full_last > 1:
            d = lax.fori_loop(1, full_last,
                              lambda g, dd: run_group(g, dd, guarded=False), dscr[...])
            dscr[...] = d
    else:
        start = jnp.where(c == 0, 1, 0)
        end = jnp.where(c == num_chunks - 1, full_last, n_groups)
        d = lax.fori_loop(start, end,
                          lambda g, dd: run_group(g, dd, guarded=False), dscr[...])
        dscr[...] = d

    # ---- peeled (guarded) partial tail group of the last chunk ----------------------
    if run_tail:
        @pl.when(c == num_chunks - 1)
        def _():
            dscr[...] = run_group(full_last, dscr[...], guarded=True)

    # ---- final delta writeback -------------------------------------------------------
    @pl.when(c == num_chunks - 1)
    def _():
        dout_ref[...] = dscr[...]


def crf_viterbi_forward(rolls, transition, loglikelihood, *, max_chunk=2048):
    """JAX/Pallas equivalent of CRF.forward(rolls) -> (path_in_reverse_order, score)."""
    T = int(rolls.shape[0])
    S = int(transition.shape[0])
    L = int(loglikelihood.shape[0])
    assert T >= 1 and 1 <= S <= SPAD, "state count must fit in one lane register"

    SSUB = max(8, ((S + 7) // 8) * 8)                             # sublane padding for states
    U = UNROLL
    chunk = min(((T + U - 1) // U) * U, max_chunk)                # timesteps per grid step
    T_pad = ((T + chunk - 1) // chunk) * chunk
    nc = T_pad // chunk
    n_groups = chunk // U

    # static bookkeeping for guard peeling
    steps_last = T - (nc - 1) * chunk                             # valid steps in last chunk
    full_last = min(n_groups, steps_last // U)                    # fully-valid groups there
    tail_exists = (steps_last % U) != 0
    run_tail = tail_exists and not (nc == 1 and full_last == 0)

    # glue: TPU-friendly padded parameter tables (emission lookup stays in-kernel)
    rolls_pad = jnp.zeros((T_pad,), jnp.int32).at[:T].set(rolls.astype(jnp.int32))

    tr = transition[:, :S].astype(jnp.float32)                    # (S, S)   [ns, ps]
    ll = loglikelihood.astype(jnp.float32)                        # (L, S)   [label, state]
    tl = tr[None, :, :] + ll[:, None, :]                          # (L, ns, ps) = trans + ll
    tll = jnp.full((L, SSUB, SPAD), NEG, jnp.float32).at[:, :S, :S].set(tl)
    tllT = jnp.full((L, SSUB, SPAD), NEG, jnp.float32).at[:, :S, :S].set(
        jnp.swapaxes(tl, 1, 2))                                   # rows=ps, lanes=ns

    d0 = transition[:, S].astype(jnp.float32) + ll[rolls[0].astype(jnp.int32)]   # (S,)
    d0_pad = jnp.full((1, SPAD), NEG, jnp.float32).at[0, :S].set(d0)

    kernel = functools.partial(
        _viterbi_kernel, seq_len=T, chunk=chunk, unroll=U, n_groups=n_groups,
        full_last=full_last, run_tail=run_tail, ssub=SSUB, num_chunks=nc)

    argmax_tab, delta_out = pl.pallas_call(
        kernel,
        out_shape=(jax.ShapeDtypeStruct((T_pad, SPAD), jnp.int32),
                   jax.ShapeDtypeStruct((SSUB, SPAD), jnp.float32)),
        grid_spec=pltpu.PrefetchScalarGridSpec(
            num_scalar_prefetch=1,                                # rolls -> SMEM
            grid=(nc,),
            in_specs=[
                pl.BlockSpec((L, SSUB, SPAD), lambda c, r: (0, 0, 0)),  # trans+ll (resident)
                pl.BlockSpec((L, SSUB, SPAD), lambda c, r: (0, 0, 0)),  # transposed table
                pl.BlockSpec((1, SPAD), lambda c, r: (0, 0)),           # initial delta
            ],
            out_specs=(
                pl.BlockSpec((chunk, SPAD), lambda c, r: (c, 0)),       # lane-dense argmax
                pl.BlockSpec((SSUB, SPAD), lambda c, r: (0, 0)),        # final delta tile
            ),
            scratch_shapes=[pltpu.VMEM((SSUB, SPAD), jnp.float32)],     # delta carry
        ),
        compiler_params=pltpu.CompilerParams(dimension_semantics=("arbitrary",)),
    )(rolls_pad, tll, tllT, d0_pad)

    # final delta layout depends on the parity of the last real step (static)
    if (T - 1) % 2 == 1:
        delta = delta_out[:S, 0]                                  # states on sublanes
    else:
        delta = delta_out[0, :S]                                  # states on lanes (incl. T==1)

    final_state = jnp.argmax(delta).astype(jnp.int32)
    final_score = delta[final_state]

    # TODO(synk): backtracking is a scalar data-dependent gather; kept in plain JAX.
    argm = argmax_tab[:T, :S]                                     # rows 1..T-1 are valid
    rows = argm[1:][::-1]                                         # steps T-1 .. 1

    def backtrack(state, row):
        new_state = row[state].astype(jnp.int32)
        return new_state, new_state

    _, prevs = jax.lax.scan(backtrack, final_state, rows)
    path = jnp.concatenate([final_state[None], prevs])            # reversed order, like PyTorch
    return path, final_score


def _viterbi_ref_numpy(rolls, transition, loglikelihood):
    """Pure-numpy replica of the PyTorch CRF._viterbi_algorithm for verification."""
    rolls = np.asarray(rolls)
    trans = np.asarray(transition, dtype=np.float32)
    ll = np.asarray(loglikelihood, dtype=np.float32)[rolls]
    S = trans.shape[0]
    prev_delta = trans[:, S] + ll[0]
    argmaxes = []
    for t in range(1, ll.shape[0]):
        roll = ll[t]
        local, nd = [], []
        for ns in range(S):
            feat = trans[ns, :S] + roll + prev_delta
            ms = int(np.argmax(feat))
            local.append(ms)
            nd.append(feat[ms])
        prev_delta = np.array(nd, dtype=np.float32)
        argmaxes.append(local)
    fs = int(np.argmax(prev_delta))
    score = float(prev_delta[fs])
    path = [fs]
    for states in reversed(argmaxes):
        fs = states[fs]
        path.append(fs)
    return np.array(path), score


if __name__ == "__main__":
    key = jax.random.PRNGKey(0)
    k_trans, k_rolls = jax.random.split(key)

    n_states = 2     # n_dice: fair / loaded
    n_labels = 6     # die faces
    seq_len = 8

    # transition = Normal(mean=-1, std=0.1) of shape (n_states, n_states + 1)
    transition = jax.random.normal(k_trans, (n_states, n_states + 1), jnp.float32) * 0.1 - 1.0

    # loglikelihood: (n_labels, n_states); column 0 = fair die, column 1 = loaded die
    probs = jnp.stack(
        [jnp.full((n_labels,), 1.0 / n_labels, jnp.float32),
         jnp.array([0.1, 0.1, 0.1, 0.1, 0.1, 0.5], jnp.float32)],
        axis=1)
    loglikelihood = jnp.log(probs)

    rolls = jax.random.randint(k_rolls, (seq_len,), 0, n_labels)

    path, score = crf_viterbi_forward(rolls, transition, loglikelihood)
    (path, score) = jax.block_until_ready((path, score))

    path_ref, score_ref = _viterbi_ref_numpy(jax.device_get(rolls),
                                             jax.device_get(transition),
                                             jax.device_get(loglikelihood))
    assert np.array_equal(np.asarray(path), path_ref), (path, path_ref)
    assert abs(float(score) - score_ref) < 1e-4, (float(score), score_ref)

    print("KERNEL_OK")
</pallas_src>

<mosaic_0001>
module attributes {stable_mosaic.version = 11 : i64} {
  func.func @_viterbi_kernel(%arg0: i32, %arg1: memref<16xi32, #tpu.memory_space<smem>>, %arg2: memref<6x8x128xf32, #tpu.memory_space<vmem>>, %arg3: memref<6x8x128xf32, #tpu.memory_space<vmem>>, %arg4: memref<1x128xf32, #tpu.memory_space<vmem>>, %arg5: memref<16x128xi32, #tpu.memory_space<vmem>>, %arg6: memref<8x128xf32, #tpu.memory_space<vmem>>, %arg7: memref<8x128xf32, #tpu.memory_space<vmem>>) attributes {dimension_semantics = [#tpu.dimension_semantics<arbitrary>], iteration_bounds = array<i64: 1>, scalar_prefetch = 1 : i64, scratch_operands = 1 : i64, tpu.core_type = #tpu.core_type<tc>, window_params = [{pipeline_mode = #tpu.pipeline_mode<synchronous>, transform_indices = @transform_0, window_bounds = array<i64: 6, 8, 128>}, {pipeline_mode = #tpu.pipeline_mode<synchronous>, transform_indices = @transform_1, window_bounds = array<i64: 6, 8, 128>}, {pipeline_mode = #tpu.pipeline_mode<synchronous>, transform_indices = @transform_2, window_bounds = array<i64: 1, 128>}, {transform_indices = @transform_3, window_bounds = array<i64: 16, 128>}, {pipeline_mode = #tpu.pipeline_mode<synchronous>, transform_indices = @transform_4, window_bounds = array<i64: 8, 128>}]} {
    %0 = tpu.iota {dimensions = array<i32: 1>} : vector<8x128xi32>
    %1 = tpu.iota {dimensions = array<i32: 0>} : vector<8x128xi32>
    %2 = arith.cmpi eq, %0, %1 : vector<8x128xi32>
    %3 = tpu.iota {dimensions = array<i32: 0>} : vector<16x128xi32>
    %c0_i32 = arith.constant 0 : i32
    %4 = arith.cmpi eq, %arg0, %c0_i32 : i32
    %5 = arith.extui %4 : i1 to i32
    %c0_i32_0 = arith.constant 0 : i32
    %6 = arith.cmpi ne, %5, %c0_i32_0 : i32
    scf.if %6 {
      %c0 = arith.constant 0 : index
      %c0_3 = arith.constant 0 : index
      %10 = vector.load %arg4[%c0, %c0_3] : memref<1x128xf32, #tpu.memory_space<vmem>>, vector<1x128xf32>
      %11 = vector.shape_cast %10 : vector<1x128xf32> to vector<1x128xf32>
      %12 = vector.broadcast %11 : vector<1x128xf32> to vector<8x128xf32>
      %c0_4 = arith.constant 0 : index
      %c0_5 = arith.constant 0 : index
      %13 = vector.load %arg6[%c0_4, %c0_5] : memref<8x128xf32, #tpu.memory_space<vmem>>, vector<8x128xf32>
      tpu.vector_store %arg6[%c0_4, %c0_5], %12 {strides = array<i32>} : memref<8x128xf32, #tpu.memory_space<vmem>>, vector<8x128xf32>,
      %c16_i32 = arith.constant 16 : i32
      %14 = arith.muli %arg0, %c16_i32 : i32
      %c0_i32_6 = arith.constant 0 : i32
      %15 = arith.addi %14, %c0_i32_6 : i32
      %c0_i32_7 = arith.constant 0 : i32
      %16 = arith.addi %15, %c0_i32_7 : i32
      %17 = arith.index_cast %16 : i32 to index
      %18 = memref.load %arg1[%17] : memref<16xi32, #tpu.memory_space<smem>>
      %19 = arith.index_cast %18 : i32 to index
      %c0_8 = arith.constant 0 : index
      %c0_9 = arith.constant 0 : index
      %20 = vector.load %arg3[%19, %c0_8, %c0_9] : memref<6x8x128xf32, #tpu.memory_space<vmem>>, vector<1x8x128xf32>
      %21 = vector.shape_cast %20 : vector<1x8x128xf32> to vector<8x128xf32>
      %c1_i32 = arith.constant 1 : i32
      %22 = arith.addi %15, %c1_i32 : i32
      %23 = arith.index_cast %22 : i32 to index
      %24 = memref.load %arg1[%23] : memref<16xi32, #tpu.memory_space<smem>>
      %25 = arith.index_cast %24 : i32 to index
      %c0_10 = arith.constant 0 : index
      %c0_11 = arith.constant 0 : index
      %26 = vector.load %arg2[%25, %c0_10, %c0_11] : memref<6x8x128xf32, #tpu.memory_space<vmem>>, vector<1x8x128xf32>
      %27 = vector.shape_cast %26 : vector<1x8x128xf32> to vector<8x128xf32>
      %c2_i32 = arith.constant 2 : i32
      %28 = arith.addi %15, %c2_i32 : i32
      %29 = arith.index_cast %28 : i32 to index
      %30 = memref.load %arg1[%29] : memref<16xi32, #tpu.memory_space<smem>>
      %31 = arith.index_cast %30 : i32 to index
      %c0_12 = arith.constant 0 : index
      %c0_13 = arith.constant 0 : index
      %32 = vector.load %arg3[%31, %c0_12, %c0_13] : memref<6x8x128xf32, #tpu.memory_space<vmem>>, vector<1x8x128xf32>
      %33 = vector.shape_cast %32 : vector<1x8x128xf32> to vector<8x128xf32>
      %c3_i32 = arith.constant 3 : i32
      %34 = arith.addi %15, %c3_i32 : i32
      %35 = arith.index_cast %34 : i32 to index
      %36 = memref.load %arg1[%35] : memref<16xi32, #tpu.memory_space<smem>>
      %37 = arith.index_cast %36 : i32 to index
      %c0_14 = arith.constant 0 : index
      %c0_15 = arith.constant 0 : index
      %38 = vector.load %arg2[%37, %c0_14, %c0_15] : memref<6x8x128xf32, #tpu.memory_space<vmem>>, vector<1x8x128xf32>
      %39 = vector.shape_cast %38 : vector<1x8x128xf32> to vector<8x128xf32>
      %c4_i32 = arith.constant 4 : i32
      %40 = arith.addi %15, %c4_i32 : i32
      %41 = arith.index_cast %40 : i32 to index
      %42 = memref.load %arg1[%41] : memref<16xi32, #tpu.memory_space<smem>>
      %43 = arith.index_cast %42 : i32 to index
      %c0_16 = arith.constant 0 : index
      %c0_17 = arith.constant 0 : index
      %44 = vector.load %arg3[%43, %c0_16, %c0_17] : memref<6x8x128xf32, #tpu.memory_space<vmem>>, vector<1x8x128xf32>
      %45 = vector.shape_cast %44 : vector<1x8x128xf32> to vector<8x128xf32>
      %c5_i32 = arith.constant 5 : i32
      %46 = arith.addi %15, %c5_i32 : i32
      %47 = arith.index_cast %46 : i32 to index
      %48 = memref.load %arg1[%47] : memref<16xi32, #tpu.memory_space<smem>>
      %49 = arith.index_cast %48 : i32 to index
      %c0_18 = arith.constant 0 : index
      %c0_19 = arith.constant 0 : index
      %50 = vector.load %arg2[%49, %c0_18, %c0_19] : memref<6x8x128xf32, #tpu.memory_space<vmem>>, vector<1x8x128xf32>
      %51 = vector.shape_cast %50 : vector<1x8x128xf32> to vector<8x128xf32>
      %c6_i32 = arith.constant 6 : i32
      %52 = arith.addi %15, %c6_i32 : i32
      %53 = arith.index_cast %52 : i32 to index
      %54 = memref.load %arg1[%53] : memref<16xi32, #tpu.memory_space<smem>>
      %55 = arith.index_cast %54 : i32 to index
      %c0_20 = arith.constant 0 : index
      %c0_21 = arith.constant 0 : index
      %56 = vector.load %arg3[%55, %c0_20, %c0_21] : memref<6x8x128xf32, #tpu.memory_space<vmem>>, vector<1x8x128xf32>
      %57 = vector.shape_cast %56 : vector<1x8x128xf32> to vector<8x128xf32>
      %c7_i32 = arith.constant 7 : i32
      %58 = arith.addi %15, %c7_i32 : i32
      %59 = arith.index_cast %58 : i32 to index
      %60 = memref.load %arg1[%59] : memref<16xi32, #tpu.memory_space<smem>>
      %61 = arith.index_cast %60 : i32 to index
      %c0_22 = arith.constant 0 : index
      %c0_23 = arith.constant 0 : index
      %62 = vector.load %arg2[%61, %c0_22, %c0_23] : memref<6x8x128xf32, #tpu.memory_space<vmem>>, vector<1x8x128xf32>
      %63 = vector.shape_cast %62 : vector<1x8x128xf32> to vector<8x128xf32>
      %c8_i32 = arith.constant 8 : i32
      %64 = arith.addi %15, %c8_i32 : i32
      %65 = arith.index_cast %64 : i32 to index
      %66 = memref.load %arg1[%65] : memref<16xi32, #tpu.memory_space<smem>>
      %67 = arith.index_cast %66 : i32 to index
      %c0_24 = arith.constant 0 : index
      %c0_25 = arith.constant 0 : index
      %68 = vector.load %arg3[%67, %c0_24, %c0_25] : memref<6x8x128xf32, #tpu.memory_space<vmem>>, vector<1x8x128xf32>
      %69 = vector.shape_cast %68 : vector<1x8x128xf32> to vector<8x128xf32>
      %c9_i32 = arith.constant 9 : i32
      %70 = arith.addi %15, %c9_i32 : i32
      %71 = arith.index_cast %70 : i32 to index
      %72 = memref.load %arg1[%71] : memref<16xi32, #tpu.memory_space<smem>>
      %73 = arith.index_cast %72 : i32 to index
      %c0_26 = arith.constant 0 : index
      %c0_27 = arith.constant 0 : index
      %74 = vector.load %arg2[%73, %c0_26, %c0_27] : memref<6x8x128xf32, #tpu.memory_space<vmem>>, vector<1x8x128xf32>
      %75 = vector.shape_cast %74 : vector<1x8x128xf32> to vector<8x128xf32>
      %c10_i32 = arith.constant 10 : i32
      %76 = arith.addi %15, %c10_i32 : i32
      %77 = arith.index_cast %76 : i32 to index
      %78 = memref.load %arg1[%77] : memref<16xi32, #tpu.memory_space<smem>>
      %79 = arith.index_cast %78 : i32 to index
      %c0_28 = arith.constant 0 : index
      %c0_29 = arith.constant 0 : index
      %80 = vector.load %arg3[%79, %c0_28, %c0_29] : memref<6x8x128xf32, #tpu.memory_space<vmem>>, vector<1x8x128xf32>
      %81 = vector.shape_cast %80 : vector<1x8x128xf32> to vector<8x128xf32>
      %c11_i32 = arith.constant 11 : i32
      %82 = arith.addi %15, %c11_i32 : i32
      %83 = arith.index_cast %82 : i32 to index
      %84 = memref.load %arg1[%83] : memref<16xi32, #tpu.memory_space<smem>>
      %85 = arith.index_cast %84 : i32 to index
      %c0_30 = arith.constant 0 : index
      %c0_31 = arith.constant 0 : index
      %86 = vector.load %arg2[%85, %c0_30, %c0_31] : memref<6x8x128xf32, #tpu.memory_space<vmem>>, vector<1x8x128xf32>
      %87 = vector.shape_cast %86 : vector<1x8x128xf32> to vector<8x128xf32>
      %c12_i32 = arith.constant 12 : i32
      %88 = arith.addi %15, %c12_i32 : i32
      %89 = arith.index_cast %88 : i32 to index
      %90 = memref.load %arg1[%89] : memref<16xi32, #tpu.memory_space<smem>>
      %91 = arith.index_cast %90 : i32 to index
      %c0_32 = arith.constant 0 : index
      %c0_33 = arith.constant 0 : index
      %92 = vector.load %arg3[%91, %c0_32, %c0_33] : memref<6x8x128xf32, #tpu.memory_space<vmem>>, vector<1x8x128xf32>
      %93 = vector.shape_cast %92 : vector<1x8x128xf32> to vector<8x128xf32>
      %c13_i32 = arith.constant 13 : i32
      %94 = arith.addi %15, %c13_i32 : i32
      %95 = arith.index_cast %94 : i32 to index
      %96 = memref.load %arg1[%95] : memref<16xi32, #tpu.memory_space<smem>>
      %97 = arith.index_cast %96 : i32 to index
      %c0_34 = arith.constant 0 : index
      %c0_35 = arith.constant 0 : index
      %98 = vector.load %arg2[%97, %c0_34, %c0_35] : memref<6x8x128xf32, #tpu.memory_space<vmem>>, vector<1x8x128xf32>
      %99 = vector.shape_cast %98 : vector<1x8x128xf32> to vector<8x128xf32>
      %c14_i32 = arith.constant 14 : i32
      %100 = arith.addi %15, %c14_i32 : i32
      %101 = arith.index_cast %100 : i32 to index
      %102 = memref.load %arg1[%101] : memref<16xi32, #tpu.memory_space<smem>>
      %103 = arith.index_cast %102 : i32 to index
      %c0_36 = arith.constant 0 : index
      %c0_37 = arith.constant 0 : index
      %104 = vector.load %arg3[%103, %c0_36, %c0_37] : memref<6x8x128xf32, #tpu.memory_space<vmem>>, vector<1x8x128xf32>
      %105 = vector.shape_cast %104 : vector<1x8x128xf32> to vector<8x128xf32>
      %c15_i32 = arith.constant 15 : i32
      %106 = arith.addi %15, %c15_i32 : i32
      %107 = arith.index_cast %106 : i32 to index
      %108 = memref.load %arg1[%107] : memref<16xi32, #tpu.memory_space<smem>>
      %109 = arith.index_cast %108 : i32 to index
      %c0_38 = arith.constant 0 : index
      %c0_39 = arith.constant 0 : index
      %110 = vector.load %arg2[%109, %c0_38, %c0_39] : memref<6x8x128xf32, #tpu.memory_space<vmem>>, vector<1x8x128xf32>
      %111 = vector.shape_cast %110 : vector<1x8x128xf32> to vector<8x128xf32>
      %c0_i32_40 = arith.constant 0 : i32
      %112 = vector.broadcast %c0_i32_40 : i32 to vector<16x128xi32>
      %113 = arith.addf %21, %12 : vector<8x128xf32>
      %cst = arith.constant dense<0xFF800000> : vector<128xf32>
      %114 = vector.multi_reduction <maximumf>, %113, %cst [0] : vector<8x128xf32> to vector<128xf32>
      %115 = vector.shape_cast %114 : vector<128xf32> to vector<1x128xf32>
      %116 = vector.broadcast %115 : vector<1x128xf32> to vector<8x128xf32>
      %117 = arith.cmpf oeq, %113, %116 : vector<8x128xf32>
      %c8_i32_41 = arith.constant 8 : i32
      %118 = vector.broadcast %c8_i32_41 : i32 to vector<8x128xi32>
      %119 = arith.select %117, %1, %118 : vector<8x128xi1>, vector<8x128xi32>
      %cst_42 = arith.constant dense<2147483647> : vector<128xi32>
      %120 = vector.multi_reduction <minsi>, %119, %cst_42 [0] : vector<8x128xi32> to vector<128xi32>
      %121 = vector.shape_cast %120 : vector<128xi32> to vector<1x128xi32>
      %122 = vector.shape_cast %115 : vector<1x128xf32> to vector<1x128xf32>
      %123 = vector.broadcast %122 : vector<1x128xf32> to vector<8x128xf32>
      %c0_i32_43 = arith.constant 0 : i32
      %124 = arith.addi %15, %c0_i32_43 : i32
      %c1_i32_44 = arith.constant 1 : i32
      %125 = arith.cmpi sge, %124, %c1_i32_44 : i32
      %c8_i32_45 = arith.constant 8 : i32
      %126 = arith.cmpi slt, %124, %c8_i32_45 : i32
      %127 = arith.andi %125, %126 : i1
      %128 = arith.select %127, %123, %12 : vector<8x128xf32>
      %c0_i32_46 = arith.constant 0 : i32
      %129 = vector.broadcast %c0_i32_46 : i32 to vector<1x128xi32>
      %130 = arith.select %127, %121, %129 : vector<1x128xi32>
      %c0_i32_47 = arith.constant 0 : i32
      %131 = vector.broadcast %c0_i32_47 : i32 to vector<16x128xi32>
      %132 = arith.cmpi eq, %3, %131 : vector<16x128xi32>
      %133 = vector.shape_cast %130 : vector<1x128xi32> to vector<1x128xi32>
      %134 = vector.broadcast %133 : vector<1x128xi32> to vector<16x128xi32>
      %135 = arith.select %132, %134, %112 : vector<16x128xi1>, vector<16x128xi32>
      %136 = arith.addf %27, %128 : vector<8x128xf32>
      %cst_48 = arith.constant dense<0xFF800000> : vector<8xf32>
      %137 = vector.multi_reduction <maximumf>, %136, %cst_48 [1] : vector<8x128xf32> to vector<8xf32>
      %138 = vector.shape_cast %137 : vector<8xf32> to vector<8x1xf32>
      %139 = vector.broadcast %138 : vector<8x1xf32> to vector<8x128xf32>
      %140 = arith.cmpf oeq, %136, %139 : vector<8x128xf32>
      %c128_i32 = arith.constant 128 : i32
      %141 = vector.broadcast %c128_i32 : i32 to vector<8x128xi32>
      %142 = arith.select %140, %0, %141 : vector<8x128xi1>, vector<8x128xi32>
      %cst_49 = arith.constant dense<2147483647> : vector<8xi32>
      %143 = vector.multi_reduction <minsi>, %142, %cst_49 [1] : vector<8x128xi32> to vector<8xi32>
      %144 = vector.shape_cast %143 : vector<8xi32> to vector<8x1xi32>
      %145 = vector.shape_cast %144 : vector<8x1xi32> to vector<8x1xi32>
      %146 = vector.broadcast %145 : vector<8x1xi32> to vector<8x128xi32>
      %c0_i32_50 = arith.constant 0 : i32
      %147 = vector.broadcast %c0_i32_50 : i32 to vector<8x128xi32>
      %148 = arith.select %2, %146, %147 : vector<8x128xi1>, vector<8x128xi32>
      %cst_51 = arith.constant dense<0> : vector<128xi32>
      %149 = vector.multi_reduction <add>, %148, %cst_51 [0] : vector<8x128xi32> to vector<128xi32>
      %150 = vector.shape_cast %149 : vector<128xi32> to vector<1x128xi32>
      %151 = vector.shape_cast %138 : vector<8x1xf32> to vector<8x1xf32>
      %152 = vector.broadcast %151 : vector<8x1xf32> to vector<8x128xf32>
      %c1_i32_52 = arith.constant 1 : i32
      %153 = arith.addi %15, %c1_i32_52 : i32
      %c1_i32_53 = arith.constant 1 : i32
      %154 = arith.cmpi sge, %153, %c1_i32_53 : i32
      %c8_i32_54 = arith.constant 8 : i32
      %155 = arith.cmpi slt, %153, %c8_i32_54 : i32
      %156 = arith.andi %154, %155 : i1
      %157 = arith.select %156, %152, %128 : vector<8x128xf32>
      %c0_i32_55 = arith.constant 0 : i32
      %158 = vector.broadcast %c0_i32_55 : i32 to vector<1x128xi32>
      %159 = arith.select %156, %150, %158 : vector<1x128xi32>
      %c1_i32_56 = arith.constant 1 : i32
      %160 = vector.broadcast %c1_i32_56 : i32 to vector<16x128xi32>
      %161 = arith.cmpi eq, %3, %160 : vector<16x128xi32>
      %162 = vector.shape_cast %159 : vector<1x128xi32> to vector<1x128xi32>
      %163 = vector.broadcast %162 : vector<1x128xi32> to vector<16x128xi32>
      %164 = arith.select %161, %163, %135 : vector<16x128xi1>, vector<16x128xi32>
      %165 = arith.addf %33, %157 : vector<8x128xf32>
      %cst_57 = arith.constant dense<0xFF800000> : vector<128xf32>
      %166 = vector.multi_reduction <maximumf>, %165, %cst_57 [0] : vector<8x128xf32> to vector<128xf32>
      %167 = vector.shape_cast %166 : vector<128xf32> to vector<1x128xf32>
      %168 = vector.broadcast %167 : vector<1x128xf32> to vector<8x128xf32>
      %169 = arith.cmpf oeq, %165, %168 : vector<8x128xf32>
      %c8_i32_58 = arith.constant 8 : i32
      %170 = vector.broadcast %c8_i32_58 : i32 to vector<8x128xi32>
      %171 = arith.select %169, %1, %170 : vector<8x128xi1>, vector<8x128xi32>
      %cst_59 = arith.constant dense<2147483647> : vector<128xi32>
      %172 = vector.multi_reduction <minsi>, %171, %cst_59 [0] : vector<8x128xi32> to vector<128xi32>
      %173 = vector.shape_cast %172 : vector<128xi32> to vector<1x128xi32>
      %174 = vector.shape_cast %167 : vector<1x128xf32> to vector<1x128xf32>
      %175 = vector.broadcast %174 : vector<1x128xf32> to vector<8x128xf32>
      %c2_i32_60 = arith.constant 2 : i32
      %176 = arith.addi %15, %c2_i32_60 : i32
      %c1_i32_61 = arith.constant 1 : i32
      %177 = arith.cmpi sge, %176, %c1_i32_61 : i32
      %c8_i32_62 = arith.constant 8 : i32
      %178 = arith.cmpi slt, %176, %c8_i32_62 : i32
      %179 = arith.andi %177, %178 : i1
      %180 = arith.select %179, %175, %157 : vector<8x128xf32>
      %c0_i32_63 = arith.constant 0 : i32
      %181 = vector.broadcast %c0_i32_63 : i32 to vector<1x128xi32>
      %182 = arith.select %179, %173, %181 : vector<1x128xi32>
      %c2_i32_64 = arith.constant 2 : i32
      %183 = vector.broadcast %c2_i32_64 : i32 to vector<16x128xi32>
      %184 = arith.cmpi eq, %3, %183 : vector<16x128xi32>
      %185 = vector.shape_cast %182 : vector<1x128xi32> to vector<1x128xi32>
      %186 = vector.broadcast %185 : vector<1x128xi32> to vector<16x128xi32>
      %187 = arith.select %184, %186, %164 : vector<16x128xi1>, vector<16x128xi32>
      %188 = arith.addf %39, %180 : vector<8x128xf32>
      %cst_65 = arith.constant dense<0xFF800000> : vector<8xf32>
      %189 = vector.multi_reduction <maximumf>, %188, %cst_65 [1] : vector<8x128xf32> to vector<8xf32>
      %190 = vector.shape_cast %189 : vector<8xf32> to vector<8x1xf32>
      %191 = vector.broadcast %190 : vector<8x1xf32> to vector<8x128xf32>
      %192 = arith.cmpf oeq, %188, %191 : vector<8x128xf32>
      %c128_i32_66 = arith.constant 128 : i32
      %193 = vector.broadcast %c128_i32_66 : i32 to vector<8x128xi32>
      %194 = arith.select %192, %0, %193 : vector<8x128xi1>, vector<8x128xi32>
      %cst_67 = arith.constant dense<2147483647> : vector<8xi32>
      %195 = vector.multi_reduction <minsi>, %194, %cst_67 [1] : vector<8x128xi32> to vector<8xi32>
      %196 = vector.shape_cast %195 : vector<8xi32> to vector<8x1xi32>
      %197 = vector.shape_cast %196 : vector<8x1xi32> to vector<8x1xi32>
      %198 = vector.broadcast %197 : vector<8x1xi32> to vector<8x128xi32>
      %c0_i32_68 = arith.constant 0 : i32
      %199 = vector.broadcast %c0_i32_68 : i32 to vector<8x128xi32>
      %200 = arith.select %2, %198, %199 : vector<8x128xi1>, vector<8x128xi32>
      %cst_69 = arith.constant dense<0> : vector<128xi32>
      %201 = vector.multi_reduction <add>, %200, %cst_69 [0] : vector<8x128xi32> to vector<128xi32>
      %202 = vector.shape_cast %201 : vector<128xi32> to vector<1x128xi32>
      %203 = vector.shape_cast %190 : vector<8x1xf32> to vector<8x1xf32>
      %204 = vector.broadcast %203 : vector<8x1xf32> to vector<8x128xf32>
      %c3_i32_70 = arith.constant 3 : i32
      %205 = arith.addi %15, %c3_i32_70 : i32
      %c1_i32_71 = arith.constant 1 : i32
      %206 = arith.cmpi sge, %205, %c1_i32_71 : i32
      %c8_i32_72 = arith.constant 8 : i32
      %207 = arith.cmpi slt, %205, %c8_i32_72 : i32
      %208 = arith.andi %206, %207 : i1
      %209 = arith.select %208, %204, %180 : vector<8x128xf32>
      %c0_i32_73 = arith.constant 0 : i32
      %210 = vector.broadcast %c0_i32_73 : i32 to vector<1x128xi32>
      %211 = arith.select %208, %202, %210 : vector<1x128xi32>
      %c3_i32_74 = arith.constant 3 : i32
      %212 = vector.broadcast %c3_i32_74 : i32 to vector<16x128xi32>
      %213 = arith.cmpi eq, %3, %212 : vector<16x128xi32>
      %214 = vector.shape_cast %211 : vector<1x128xi32> to vector<1x128xi32>
      %215 = vector.broadcast %214 : vector<1x128xi32> to vector<16x128xi32>
      %216 = arith.select %213, %215, %187 : vector<16x128xi1>, vector<16x128xi32>
      %217 = arith.addf %45, %209 : vector<8x128xf32>
      %cst_75 = arith.constant dense<0xFF800000> : vector<128xf32>
      %218 = vector.multi_reduction <maximumf>, %217, %cst_75 [0] : vector<8x128xf32> to vector<128xf32>
      %219 = vector.shape_cast %218 : vector<128xf32> to vector<1x128xf32>
      %220 = vector.broadcast %219 : vector<1x128xf32> to vector<8x128xf32>
      %221 = arith.cmpf oeq, %217, %220 : vector<8x128xf32>
      %c8_i32_76 = arith.constant 8 : i32
      %222 = vector.broadcast %c8_i32_76 : i32 to vector<8x128xi32>
      %223 = arith.select %221, %1, %222 : vector<8x128xi1>, vector<8x128xi32>
      %cst_77 = arith.constant dense<2147483647> : vector<128xi32>
      %224 = vector.multi_reduction <minsi>, %223, %cst_77 [0] : vector<8x128xi32> to vector<128xi32>
      %225 = vector.shape_cast %224 : vector<128xi32> to vector<1x128xi32>
      %226 = vector.shape_cast %219 : vector<1x128xf32> to vector<1x128xf32>
      %227 = vector.broadcast %226 : vector<1x128xf32> to vector<8x128xf32>
      %c4_i32_78 = arith.constant 4 : i32
      %228 = arith.addi %15, %c4_i32_78 : i32
      %c1_i32_79 = arith.constant 1 : i32
      %229 = arith.cmpi sge, %228, %c1_i32_79 : i32
      %c8_i32_80 = arith.constant 8 : i32
      %230 = arith.cmpi slt, %228, %c8_i32_80 : i32
      %231 = arith.andi %229, %230 : i1
      %232 = arith.select %231, %227, %209 : vector<8x128xf32>
      %c0_i32_81 = arith.constant 0 : i32
      %233 = vector.broadcast %c0_i32_81 : i32 to vector<1x128xi32>
      %234 = arith.select %231, %225, %233 : vector<1x128xi32>
      %c4_i32_82 = arith.constant 4 : i32
      %235 = vector.broadcast %c4_i32_82 : i32 to vector<16x128xi32>
      %236 = arith.cmpi eq, %3, %235 : vector<16x128xi32>
      %237 = vector.shape_cast %234 : vector<1x128xi32> to vector<1x128xi32>
      %238 = vector.broadcast %237 : vector<1x128xi32> to vector<16x128xi32>
      %239 = arith.select %236, %238, %216 : vector<16x128xi1>, vector<16x128xi32>
      %240 = arith.addf %51, %232 : vector<8x128xf32>
      %cst_83 = arith.constant dense<0xFF800000> : vector<8xf32>
      %241 = vector.multi_reduction <maximumf>, %240, %cst_83 [1] : vector<8x128xf32> to vector<8xf32>
      %242 = vector.shape_cast %241 : vector<8xf32> to vector<8x1xf32>
      %243 = vector.broadcast %242 : vector<8x1xf32> to vector<8x128xf32>
      %244 = arith.cmpf oeq, %240, %243 : vector<8x128xf32>
      %c128_i32_84 = arith.constant 128 : i32
      %245 = vector.broadcast %c128_i32_84 : i32 to vector<8x128xi32>
      %246 = arith.select %244, %0, %245 : vector<8x128xi1>, vector<8x128xi32>
      %cst_85 = arith.constant dense<2147483647> : vector<8xi32>
      %247 = vector.multi_reduction <minsi>, %246, %cst_85 [1] : vector<8x128xi32> to vector<8xi32>
      %248 = vector.shape_cast %247 : vector<8xi32> to vector<8x1xi32>
      %249 = vector.shape_cast %248 : vector<8x1xi32> to vector<8x1xi32>
      %250 = vector.broadcast %249 : vector<8x1xi32> to vector<8x128xi32>
      %c0_i32_86 = arith.constant 0 : i32
      %251 = vector.broadcast %c0_i32_86 : i32 to vector<8x128xi32>
      %252 = arith.select %2, %250, %251 : vector<8x128xi1>, vector<8x128xi32>
      %cst_87 = arith.constant dense<0> : vector<128xi32>
      %253 = vector.multi_reduction <add>, %252, %cst_87 [0] : vector<8x128xi32> to vector<128xi32>
      %254 = vector.shape_cast %253 : vector<128xi32> to vector<1x128xi32>
      %255 = vector.shape_cast %242 : vector<8x1xf32> to vector<8x1xf32>
      %256 = vector.broadcast %255 : vector<8x1xf32> to vector<8x128xf32>
      %c5_i32_88 = arith.constant 5 : i32
      %257 = arith.addi %15, %c5_i32_88 : i32
      %c1_i32_89 = arith.constant 1 : i32
      %258 = arith.cmpi sge, %257, %c1_i32_89 : i32
      %c8_i32_90 = arith.constant 8 : i32
      %259 = arith.cmpi slt, %257, %c8_i32_90 : i32
      %260 = arith.andi %258, %259 : i1
      %261 = arith.select %260, %256, %232 : vector<8x128xf32>
      %c0_i32_91 = arith.constant 0 : i32
      %262 = vector.broadcast %c0_i32_91 : i32 to vector<1x128xi32>
      %263 = arith.select %260, %254, %262 : vector<1x128xi32>
      %c5_i32_92 = arith.constant 5 : i32
      %264 = vector.broadcast %c5_i32_92 : i32 to vector<16x128xi32>
      %265 = arith.cmpi eq, %3, %264 : vector<16x128xi32>
      %266 = vector.shape_cast %263 : vector<1x128xi32> to vector<1x128xi32>
      %267 = vector.broadcast %266 : vector<1x128xi32> to vector<16x128xi32>
      %268 = arith.select %265, %267, %239 : vector<16x128xi1>, vector<16x128xi32>
      %269 = arith.addf %57, %261 : vector<8x128xf32>
      %cst_93 = arith.constant dense<0xFF800000> : vector<128xf32>
      %270 = vector.multi_reduction <maximumf>, %269, %cst_93 [0] : vector<8x128xf32> to vector<128xf32>
      %271 = vector.shape_cast %270 : vector<128xf32> to vector<1x128xf32>
      %272 = vector.broadcast %271 : vector<1x128xf32> to vector<8x128xf32>
      %273 = arith.cmpf oeq, %269, %272 : vector<8x128xf32>
      %c8_i32_94 = arith.constant 8 : i32
      %274 = vector.broadcast %c8_i32_94 : i32 to vector<8x128xi32>
      %275 = arith.select %273, %1, %274 : vector<8x128xi1>, vector<8x128xi32>
      %cst_95 = arith.constant dense<2147483647> : vector<128xi32>
      %276 = vector.multi_reduction <minsi>, %275, %cst_95 [0] : vector<8x128xi32> to vector<128xi32>
      %277 = vector.shape_cast %276 : vector<128xi32> to vector<1x128xi32>
      %278 = vector.shape_cast %271 : vector<1x128xf32> to vector<1x128xf32>
      %279 = vector.broadcast %278 : vector<1x128xf32> to vector<8x128xf32>
      %c6_i32_96 = arith.constant 6 : i32
      %280 = arith.addi %15, %c6_i32_96 : i32
      %c1_i32_97 = arith.constant 1 : i32
      %281 = arith.cmpi sge, %280, %c1_i32_97 : i32
      %c8_i32_98 = arith.constant 8 : i32
      %282 = arith.cmpi slt, %280, %c8_i32_98 : i32
      %283 = arith.andi %281, %282 : i1
      %284 = arith.select %283, %279, %261 : vector<8x128xf32>
      %c0_i32_99 = arith.constant 0 : i32
      %285 = vector.broadcast %c0_i32_99 : i32 to vector<1x128xi32>
      %286 = arith.select %283, %277, %285 : vector<1x128xi32>
      %c6_i32_100 = arith.constant 6 : i32
      %287 = vector.broadcast %c6_i32_100 : i32 to vector<16x128xi32>
      %288 = arith.cmpi eq, %3, %287 : vector<16x128xi32>
      %289 = vector.shape_cast %286 : vector<1x128xi32> to vector<1x128xi32>
      %290 = vector.broadcast %289 : vector<1x128xi32> to vector<16x128xi32>
      %291 = arith.select %288, %290, %268 : vector<16x128xi1>, vector<16x128xi32>
      %292 = arith.addf %63, %284 : vector<8x128xf32>
      %cst_101 = arith.constant dense<0xFF800000> : vector<8xf32>
      %293 = vector.multi_reduction <maximumf>, %292, %cst_101 [1] : vector<8x128xf32> to vector<8xf32>
      %294 = vector.shape_cast %293 : vector<8xf32> to vector<8x1xf32>
      %295 = vector.broadcast %294 : vector<8x1xf32> to vector<8x128xf32>
      %296 = arith.cmpf oeq, %292, %295 : vector<8x128xf32>
      %c128_i32_102 = arith.constant 128 : i32
      %297 = vector.broadcast %c128_i32_102 : i32 to vector<8x128xi32>
      %298 = arith.select %296, %0, %297 : vector<8x128xi1>, vector<8x128xi32>
      %cst_103 = arith.constant dense<2147483647> : vector<8xi32>
      %299 = vector.multi_reduction <minsi>, %298, %cst_103 [1] : vector<8x128xi32> to vector<8xi32>
      %300 = vector.shape_cast %299 : vector<8xi32> to vector<8x1xi32>
      %301 = vector.shape_cast %300 : vector<8x1xi32> to vector<8x1xi32>
      %302 = vector.broadcast %301 : vector<8x1xi32> to vector<8x128xi32>
      %c0_i32_104 = arith.constant 0 : i32
      %303 = vector.broadcast %c0_i32_104 : i32 to vector<8x128xi32>
      %304 = arith.select %2, %302, %303 : vector<8x128xi1>, vector<8x128xi32>
      %cst_105 = arith.constant dense<0> : vector<128xi32>
      %305 = vector.multi_reduction <add>, %304, %cst_105 [0] : vector<8x128xi32> to vector<128xi32>
      %306 = vector.shape_cast %305 : vector<128xi32> to vector<1x128xi32>
      %307 = vector.shape_cast %294 : vector<8x1xf32> to vector<8x1xf32>
      %308 = vector.broadcast %307 : vector<8x1xf32> to vector<8x128xf32>
      %c7_i32_106 = arith.constant 7 : i32
      %309 = arith.addi %15, %c7_i32_106 : i32
      %c1_i32_107 = arith.constant 1 : i32
      %310 = arith.cmpi sge, %309, %c1_i32_107 : i32
      %c8_i32_108 = arith.constant 8 : i32
      %311 = arith.cmpi slt, %309, %c8_i32_108 : i32
      %312 = arith.andi %310, %311 : i1
      %313 = arith.select %312, %308, %284 : vector<8x128xf32>
      %c0_i32_109 = arith.constant 0 : i32
      %314 = vector.broadcast %c0_i32_109 : i32 to vector<1x128xi32>
      %315 = arith.select %312, %306, %314 : vector<1x128xi32>
      %c7_i32_110 = arith.constant 7 : i32
      %316 = vector.broadcast %c7_i32_110 : i32 to vector<16x128xi32>
      %317 = arith.cmpi eq, %3, %316 : vector<16x128xi32>
      %318 = vector.shape_cast %315 : vector<1x128xi32> to vector<1x128xi32>
      %319 = vector.broadcast %318 : vector<1x128xi32> to vector<16x128xi32>
      %320 = arith.select %317, %319, %291 : vector<16x128xi1>, vector<16x128xi32>
      %321 = arith.addf %69, %313 : vector<8x128xf32>
      %cst_111 = arith.constant dense<0xFF800000> : vector<128xf32>
      %322 = vector.multi_reduction <maximumf>, %321, %cst_111 [0] : vector<8x128xf32> to vector<128xf32>
      %323 = vector.shape_cast %322 : vector<128xf32> to vector<1x128xf32>
      %324 = vector.broadcast %323 : vector<1x128xf32> to vector<8x128xf32>
      %325 = arith.cmpf oeq, %321, %324 : vector<8x128xf32>
      %c8_i32_112 = arith.constant 8 : i32
      %326 = vector.broadcast %c8_i32_112 : i32 to vector<8x128xi32>
      %327 = arith.select %325, %1, %326 : vector<8x128xi1>, vector<8x128xi32>
      %cst_113 = arith.constant dense<2147483647> : vector<128xi32>
      %328 = vector.multi_reduction <minsi>, %327, %cst_113 [0] : vector<8x128xi32> to vector<128xi32>
      %329 = vector.shape_cast %328 : vector<128xi32> to vector<1x128xi32>
      %330 = vector.shape_cast %323 : vector<1x128xf32> to vector<1x128xf32>
      %331 = vector.broadcast %330 : vector<1x128xf32> to vector<8x128xf32>
      %c8_i32_114 = arith.constant 8 : i32
      %332 = arith.addi %15, %c8_i32_114 : i32
      %c1_i32_115 = arith.constant 1 : i32
      %333 = arith.cmpi sge, %332, %c1_i32_115 : i32
      %c8_i32_116 = arith.constant 8 : i32
      %334 = arith.cmpi slt, %332, %c8_i32_116 : i32
      %335 = arith.andi %333, %334 : i1
      %336 = arith.select %335, %331, %313 : vector<8x128xf32>
      %c0_i32_117 = arith.constant 0 : i32
      %337 = vector.broadcast %c0_i32_117 : i32 to vector<1x128xi32>
      %338 = arith.select %335, %329, %337 : vector<1x128xi32>
      %c8_i32_118 = arith.constant 8 : i32
      %339 = vector.broadcast %c8_i32_118 : i32 to vector<16x128xi32>
      %340 = arith.cmpi eq, %3, %339 : vector<16x128xi32>
      %341 = vector.shape_cast %338 : vector<1x128xi32> to vector<1x128xi32>
      %342 = vector.broadcast %341 : vector<1x128xi32> to vector<16x128xi32>
      %343 = arith.select %340, %342, %320 : vector<16x128xi1>, vector<16x128xi32>
      %344 = arith.addf %75, %336 : vector<8x128xf32>
      %cst_119 = arith.constant dense<0xFF800000> : vector<8xf32>
      %345 = vector.multi_reduction <maximumf>, %344, %cst_119 [1] : vector<8x128xf32> to vector<8xf32>
      %346 = vector.shape_cast %345 : vector<8xf32> to vector<8x1xf32>
      %347 = vector.broadcast %346 : vector<8x1xf32> to vector<8x128xf32>
      %348 = arith.cmpf oeq, %344, %347 : vector<8x128xf32>
      %c128_i32_120 = arith.constant 128 : i32
      %349 = vector.broadcast %c128_i32_120 : i32 to vector<8x128xi32>
      %350 = arith.select %348, %0, %349 : vector<8x128xi1>, vector<8x128xi32>
      %cst_121 = arith.constant dense<2147483647> : vector<8xi32>
      %351 = vector.multi_reduction <minsi>, %350, %cst_121 [1] : vector<8x128xi32> to vector<8xi32>
      %352 = vector.shape_cast %351 : vector<8xi32> to vector<8x1xi32>
      %353 = vector.shape_cast %352 : vector<8x1xi32> to vector<8x1xi32>
      %354 = vector.broadcast %353 : vector<8x1xi32> to vector<8x128xi32>
      %c0_i32_122 = arith.constant 0 : i32
      %355 = vector.broadcast %c0_i32_122 : i32 to vector<8x128xi32>
      %356 = arith.select %2, %354, %355 : vector<8x128xi1>, vector<8x128xi32>
      %cst_123 = arith.constant dense<0> : vector<128xi32>
      %357 = vector.multi_reduction <add>, %356, %cst_123 [0] : vector<8x128xi32> to vector<128xi32>
      %358 = vector.shape_cast %357 : vector<128xi32> to vector<1x128xi32>
      %359 = vector.shape_cast %346 : vector<8x1xf32> to vector<8x1xf32>
      %360 = vector.broadcast %359 : vector<8x1xf32> to vector<8x128xf32>
      %c9_i32_124 = arith.constant 9 : i32
      %361 = arith.addi %15, %c9_i32_124 : i32
      %c1_i32_125 = arith.constant 1 : i32
      %362 = arith.cmpi sge, %361, %c1_i32_125 : i32
      %c8_i32_126 = arith.constant 8 : i32
      %363 = arith.cmpi slt, %361, %c8_i32_126 : i32
      %364 = arith.andi %362, %363 : i1
      %365 = arith.select %364, %360, %336 : vector<8x128xf32>
      %c0_i32_127 = arith.constant 0 : i32
      %366 = vector.broadcast %c0_i32_127 : i32 to vector<1x128xi32>
      %367 = arith.select %364, %358, %366 : vector<1x128xi32>
      %c9_i32_128 = arith.constant 9 : i32
      %368 = vector.broadcast %c9_i32_128 : i32 to vector<16x128xi32>
      %369 = arith.cmpi eq, %3, %368 : vector<16x128xi32>
      %370 = vector.shape_cast %367 : vector<1x128xi32> to vector<1x128xi32>
      %371 = vector.broadcast %370 : vector<1x128xi32> to vector<16x128xi32>
      %372 = arith.select %369, %371, %343 : vector<16x128xi1>, vector<16x128xi32>
      %373 = arith.addf %81, %365 : vector<8x128xf32>
      %cst_129 = arith.constant dense<0xFF800000> : vector<128xf32>
      %374 = vector.multi_reduction <maximumf>, %373, %cst_129 [0] : vector<8x128xf32> to vector<128xf32>
      %375 = vector.shape_cast %374 : vector<128xf32> to vector<1x128xf32>
      %376 = vector.broadcast %375 : vector<1x128xf32> to vector<8x128xf32>
      %377 = arith.cmpf oeq, %373, %376 : vector<8x128xf32>
      %c8_i32_130 = arith.constant 8 : i32
      %378 = vector.broadcast %c8_i32_130 : i32 to vector<8x128xi32>
      %379 = arith.select %377, %1, %378 : vector<8x128xi1>, vector<8x128xi32>
      %cst_131 = arith.constant dense<2147483647> : vector<128xi32>
      %380 = vector.multi_reduction <minsi>, %379, %cst_131 [0] : vector<8x128xi32> to vector<128xi32>
      %381 = vector.shape_cast %380 : vector<128xi32> to vector<1x128xi32>
      %382 = vector.shape_cast %375 : vector<1x128xf32> to vector<1x128xf32>
      %383 = vector.broadcast %382 : vector<1x128xf32> to vector<8x128xf32>
      %c10_i32_132 = arith.constant 10 : i32
      %384 = arith.addi %15, %c10_i32_132 : i32
      %c1_i32_133 = arith.constant 1 : i32
      %385 = arith.cmpi sge, %384, %c1_i32_133 : i32
      %c8_i32_134 = arith.constant 8 : i32
      %386 = arith.cmpi slt, %384, %c8_i32_134 : i32
      %387 = arith.andi %385, %386 : i1
      %388 = arith.select %387, %383, %365 : vector<8x128xf32>
      %c0_i32_135 = arith.constant 0 : i32
      %389 = vector.broadcast %c0_i32_135 : i32 to vector<1x128xi32>
      %390 = arith.select %387, %381, %389 : vector<1x128xi32>
      %c10_i32_136 = arith.constant 10 : i32
      %391 = vector.broadcast %c10_i32_136 : i32 to vector<16x128xi32>
      %392 = arith.cmpi eq, %3, %391 : vector<16x128xi32>
      %393 = vector.shape_cast %390 : vector<1x128xi32> to vector<1x128xi32>
      %394 = vector.broadcast %393 : vector<1x128xi32> to vector<16x128xi32>
      %395 = arith.select %392, %394, %372 : vector<16x128xi1>, vector<16x128xi32>
      %396 = arith.addf %87, %388 : vector<8x128xf32>
      %cst_137 = arith.constant dense<0xFF800000> : vector<8xf32>
      %397 = vector.multi_reduction <maximumf>, %396, %cst_137 [1] : vector<8x128xf32> to vector<8xf32>
      %398 = vector.shape_cast %397 : vector<8xf32> to vector<8x1xf32>
      %399 = vector.broadcast %398 : vector<8x1xf32> to vector<8x128xf32>
      %400 = arith.cmpf oeq, %396, %399 : vector<8x128xf32>
      %c128_i32_138 = arith.constant 128 : i32
      %401 = vector.broadcast %c128_i32_138 : i32 to vector<8x128xi32>
      %402 = arith.select %400, %0, %401 : vector<8x128xi1>, vector<8x128xi32>
      %cst_139 = arith.constant dense<2147483647> : vector<8xi32>
      %403 = vector.multi_reduction <minsi>, %402, %cst_139 [1] : vector<8x128xi32> to vector<8xi32>
      %404 = vector.shape_cast %403 : vector<8xi32> to vector<8x1xi32>
      %405 = vector.shape_cast %404 : vector<8x1xi32> to vector<8x1xi32>
      %406 = vector.broadcast %405 : vector<8x1xi32> to vector<8x128xi32>
      %c0_i32_140 = arith.constant 0 : i32
      %407 = vector.broadcast %c0_i32_140 : i32 to vector<8x128xi32>
      %408 = arith.select %2, %406, %407 : vector<8x128xi1>, vector<8x128xi32>
      %cst_141 = arith.constant dense<0> : vector<128xi32>
      %409 = vector.multi_reduction <add>, %408, %cst_141 [0] : vector<8x128xi32> to vector<128xi32>
      %410 = vector.shape_cast %409 : vector<128xi32> to vector<1x128xi32>
      %411 = vector.shape_cast %398 : vector<8x1xf32> to vector<8x1xf32>
      %412 = vector.broadcast %411 : vector<8x1xf32> to vector<8x128xf32>
      %c11_i32_142 = arith.constant 11 : i32
      %413 = arith.addi %15, %c11_i32_142 : i32
      %c1_i32_143 = arith.constant 1 : i32
      %414 = arith.cmpi sge, %413, %c1_i32_143 : i32
      %c8_i32_144 = arith.constant 8 : i32
      %415 = arith.cmpi slt, %413, %c8_i32_144 : i32
      %416 = arith.andi %414, %415 : i1
      %417 = arith.select %416, %412, %388 : vector<8x128xf32>
      %c0_i32_145 = arith.constant 0 : i32
      %418 = vector.broadcast %c0_i32_145 : i32 to vector<1x128xi32>
      %419 = arith.select %416, %410, %418 : vector<1x128xi32>
      %c11_i32_146 = arith.constant 11 : i32
      %420 = vector.broadcast %c11_i32_146 : i32 to vector<16x128xi32>
      %421 = arith.cmpi eq, %3, %420 : vector<16x128xi32>
      %422 = vector.shape_cast %419 : vector<1x128xi32> to vector<1x128xi32>
      %423 = vector.broadcast %422 : vector<1x128xi32> to vector<16x128xi32>
      %424 = arith.select %421, %423, %395 : vector<16x128xi1>, vector<16x128xi32>
      %425 = arith.addf %93, %417 : vector<8x128xf32>
      %cst_147 = arith.constant dense<0xFF800000> : vector<128xf32>
      %426 = vector.multi_reduction <maximumf>, %425, %cst_147 [0] : vector<8x128xf32> to vector<128xf32>
      %427 = vector.shape_cast %426 : vector<128xf32> to vector<1x128xf32>
      %428 = vector.broadcast %427 : vector<1x128xf32> to vector<8x128xf32>
      %429 = arith.cmpf oeq, %425, %428 : vector<8x128xf32>
      %c8_i32_148 = arith.constant 8 : i32
      %430 = vector.broadcast %c8_i32_148 : i32 to vector<8x128xi32>
      %431 = arith.select %429, %1, %430 : vector<8x128xi1>, vector<8x128xi32>
      %cst_149 = arith.constant dense<2147483647> : vector<128xi32>
      %432 = vector.multi_reduction <minsi>, %431, %cst_149 [0] : vector<8x128xi32> to vector<128xi32>
      %433 = vector.shape_cast %432 : vector<128xi32> to vector<1x128xi32>
      %434 = vector.shape_cast %427 : vector<1x128xf32> to vector<1x128xf32>
      %435 = vector.broadcast %434 : vector<1x128xf32> to vector<8x128xf32>
      %c12_i32_150 = arith.constant 12 : i32
      %436 = arith.addi %15, %c12_i32_150 : i32
      %c1_i32_151 = arith.constant 1 : i32
      %437 = arith.cmpi sge, %436, %c1_i32_151 : i32
      %c8_i32_152 = arith.constant 8 : i32
      %438 = arith.cmpi slt, %436, %c8_i32_152 : i32
      %439 = arith.andi %437, %438 : i1
      %440 = arith.select %439, %435, %417 : vector<8x128xf32>
      %c0_i32_153 = arith.constant 0 : i32
      %441 = vector.broadcast %c0_i32_153 : i32 to vector<1x128xi32>
      %442 = arith.select %439, %433, %441 : vector<1x128xi32>
      %c12_i32_154 = arith.constant 12 : i32
      %443 = vector.broadcast %c12_i32_154 : i32 to vector<16x128xi32>
      %444 = arith.cmpi eq, %3, %443 : vector<16x128xi32>
      %445 = vector.shape_cast %442 : vector<1x128xi32> to vector<1x128xi32>
      %446 = vector.broadcast %445 : vector<1x128xi32> to vector<16x128xi32>
      %447 = arith.select %444, %446, %424 : vector<16x128xi1>, vector<16x128xi32>
      %448 = arith.addf %99, %440 : vector<8x128xf32>
      %cst_155 = arith.constant dense<0xFF800000> : vector<8xf32>
      %449 = vector.multi_reduction <maximumf>, %448, %cst_155 [1] : vector<8x128xf32> to vector<8xf32>
      %450 = vector.shape_cast %449 : vector<8xf32> to vector<8x1xf32>
      %451 = vector.broadcast %450 : vector<8x1xf32> to vector<8x128xf32>
      %452 = arith.cmpf oeq, %448, %451 : vector<8x128xf32>
      %c128_i32_156 = arith.constant 128 : i32
      %453 = vector.broadcast %c128_i32_156 : i32 to vector<8x128xi32>
      %454 = arith.select %452, %0, %453 : vector<8x128xi1>, vector<8x128xi32>
      %cst_157 = arith.constant dense<2147483647> : vector<8xi32>
      %455 = vector.multi_reduction <minsi>, %454, %cst_157 [1] : vector<8x128xi32> to vector<8xi32>
      %456 = vector.shape_cast %455 : vector<8xi32> to vector<8x1xi32>
      %457 = vector.shape_cast %456 : vector<8x1xi32> to vector<8x1xi32>
      %458 = vector.broadcast %457 : vector<8x1xi32> to vector<8x128xi32>
      %c0_i32_158 = arith.constant 0 : i32
      %459 = vector.broadcast %c0_i32_158 : i32 to vector<8x128xi32>
      %460 = arith.select %2, %458, %459 : vector<8x128xi1>, vector<8x128xi32>
      %cst_159 = arith.constant dense<0> : vector<128xi32>
      %461 = vector.multi_reduction <add>, %460, %cst_159 [0] : vector<8x128xi32> to vector<128xi32>
      %462 = vector.shape_cast %461 : vector<128xi32> to vector<1x128xi32>
      %463 = vector.shape_cast %450 : vector<8x1xf32> to vector<8x1xf32>
      %464 = vector.broadcast %463 : vector<8x1xf32> to vector<8x128xf32>
      %c13_i32_160 = arith.constant 13 : i32
      %465 = arith.addi %15, %c13_i32_160 : i32
      %c1_i32_161 = arith.constant 1 : i32
      %466 = arith.cmpi sge, %465, %c1_i32_161 : i32
      %c8_i32_162 = arith.constant 8 : i32
      %467 = arith.cmpi slt, %465, %c8_i32_162 : i32
      %468 = arith.andi %466, %467 : i1
      %469 = arith.select %468, %464, %440 : vector<8x128xf32>
      %c0_i32_163 = arith.constant 0 : i32
      %470 = vector.broadcast %c0_i32_163 : i32 to vector<1x128xi32>
      %471 = arith.select %468, %462, %470 : vector<1x128xi32>
      %c13_i32_164 = arith.constant 13 : i32
      %472 = vector.broadcast %c13_i32_164 : i32 to vector<16x128xi32>
      %473 = arith.cmpi eq, %3, %472 : vector<16x128xi32>
      %474 = vector.shape_cast %471 : vector<1x128xi32> to vector<1x128xi32>
      %475 = vector.broadcast %474 : vector<1x128xi32> to vector<16x128xi32>
      %476 = arith.select %473, %475, %447 : vector<16x128xi1>, vector<16x128xi32>
      %477 = arith.addf %105, %469 : vector<8x128xf32>
      %cst_165 = arith.constant dense<0xFF800000> : vector<128xf32>
      %478 = vector.multi_reduction <maximumf>, %477, %cst_165 [0] : vector<8x128xf32> to vector<128xf32>
      %479 = vector.shape_cast %478 : vector<128xf32> to vector<1x128xf32>
      %480 = vector.broadcast %479 : vector<1x128xf32> to vector<8x128xf32>
      %481 = arith.cmpf oeq, %477, %480 : vector<8x128xf32>
      %c8_i32_166 = arith.constant 8 : i32
      %482 = vector.broadcast %c8_i32_166 : i32 to vector<8x128xi32>
      %483 = arith.select %481, %1, %482 : vector<8x128xi1>, vector<8x128xi32>
      %cst_167 = arith.constant dense<2147483647> : vector<128xi32>
      %484 = vector.multi_reduction <minsi>, %483, %cst_167 [0] : vector<8x128xi32> to vector<128xi32>
      %485 = vector.shape_cast %484 : vector<128xi32> to vector<1x128xi32>
      %486 = vector.shape_cast %479 : vector<1x128xf32> to vector<1x128xf32>
      %487 = vector.broadcast %486 : vector<1x128xf32> to vector<8x128xf32>
      %c14_i32_168 = arith.constant 14 : i32
      %488 = arith.addi %15, %c14_i32_168 : i32
      %c1_i32_169 = arith.constant 1 : i32
      %489 = arith.cmpi sge, %488, %c1_i32_169 : i32
      %c8_i32_170 = arith.constant 8 : i32
      %490 = arith.cmpi slt, %488, %c8_i32_170 : i32
      %491 = arith.andi %489, %490 : i1
      %492 = arith.select %491, %487, %469 : vector<8x128xf32>
      %c0_i32_171 = arith.constant 0 : i32
      %493 = vector.broadcast %c0_i32_171 : i32 to vector<1x128xi32>
      %494 = arith.select %491, %485, %493 : vector<1x128xi32>
      %c14_i32_172 = arith.constant 14 : i32
      %495 = vector.broadcast %c14_i32_172 : i32 to vector<16x128xi32>
      %496 = arith.cmpi eq, %3, %495 : vector<16x128xi32>
      %497 = vector.shape_cast %494 : vector<1x128xi32> to vector<1x128xi32>
      %498 = vector.broadcast %497 : vector<1x128xi32> to vector<16x128xi32>
      %499 = arith.select %496, %498, %476 : vector<16x128xi1>, vector<16x128xi32>
      %500 = arith.addf %111, %492 : vector<8x128xf32>
      %cst_173 = arith.constant dense<0xFF800000> : vector<8xf32>
      %501 = vector.multi_reduction <maximumf>, %500, %cst_173 [1] : vector<8x128xf32> to vector<8xf32>
      %502 = vector.shape_cast %501 : vector<8xf32> to vector<8x1xf32>
      %503 = vector.broadcast %502 : vector<8x1xf32> to vector<8x128xf32>
      %504 = arith.cmpf oeq, %500, %503 : vector<8x128xf32>
      %c128_i32_174 = arith.constant 128 : i32
      %505 = vector.broadcast %c128_i32_174 : i32 to vector<8x128xi32>
      %506 = arith.select %504, %0, %505 : vector<8x128xi1>, vector<8x128xi32>
      %cst_175 = arith.constant dense<2147483647> : vector<8xi32>
      %507 = vector.multi_reduction <minsi>, %506, %cst_175 [1] : vector<8x128xi32> to vector<8xi32>
      %508 = vector.shape_cast %507 : vector<8xi32> to vector<8x1xi32>
      %509 = vector.shape_cast %508 : vector<8x1xi32> to vector<8x1xi32>
      %510 = vector.broadcast %509 : vector<8x1xi32> to vector<8x128xi32>
      %c0_i32_176 = arith.constant 0 : i32
      %511 = vector.broadcast %c0_i32_176 : i32 to vector<8x128xi32>
      %512 = arith.select %2, %510, %511 : vector<8x128xi1>, vector<8x128xi32>
      %cst_177 = arith.constant dense<0> : vector<128xi32>
      %513 = vector.multi_reduction <add>, %512, %cst_177 [0] : vector<8x128xi32> to vector<128xi32>
      %514 = vector.shape_cast %513 : vector<128xi32> to vector<1x128xi32>
      %515 = vector.shape_cast %502 : vector<8x1xf32> to vector<8x1xf32>
      %516 = vector.broadcast %515 : vector<8x1xf32> to vector<8x128xf32>
      %c15_i32_178 = arith.constant 15 : i32
      %517 = arith.addi %15, %c15_i32_178 : i32
      %c1_i32_179 = arith.constant 1 : i32
      %518 = arith.cmpi sge, %517, %c1_i32_179 : i32
      %c8_i32_180 = arith.constant 8 : i32
      %519 = arith.cmpi slt, %517, %c8_i32_180 : i32
      %520 = arith.andi %518, %519 : i1
      %521 = arith.select %520, %516, %492 : vector<8x128xf32>
      %c0_i32_181 = arith.constant 0 : i32
      %522 = vector.broadcast %c0_i32_181 : i32 to vector<1x128xi32>
      %523 = arith.select %520, %514, %522 : vector<1x128xi32>
      %c15_i32_182 = arith.constant 15 : i32
      %524 = vector.broadcast %c15_i32_182 : i32 to vector<16x128xi32>
      %525 = arith.cmpi eq, %3, %524 : vector<16x128xi32>
      %526 = vector.shape_cast %523 : vector<1x128xi32> to vector<1x128xi32>
      %527 = vector.broadcast %526 : vector<1x128xi32> to vector<16x128xi32>
      %528 = arith.select %525, %527, %499 : vector<16x128xi1>, vector<16x128xi32>
      %c0_i32_183 = arith.constant 0 : i32
      %529 = tpu.assume_multiple %c0_i32_183, 16 : i32
      %530 = arith.index_cast %529 : i32 to index
      %c0_184 = arith.constant 0 : index
      %531 = vector.load %arg5[%530, %c0_184] : memref<16x128xi32, #tpu.memory_space<vmem>>, vector<16x128xi32>
      tpu.vector_store %arg5[%530, %c0_184], %528 {strides = array<i32>} : memref<16x128xi32, #tpu.memory_space<vmem>>, vector<16x128xi32>,
      %c0_185 = arith.constant 0 : index
      %c0_186 = arith.constant 0 : index
      %532 = vector.load %arg7[%c0_185, %c0_186] : memref<8x128xf32, #tpu.memory_space<vmem>>, vector<8x128xf32>
      tpu.vector_store %arg7[%c0_185, %c0_186], %521 {strides = array<i32>} : memref<8x128xf32, #tpu.memory_space<vmem>>, vector<8x128xf32>,
    } else {
    }
    %c0_i32_1 = arith.constant 0 : i32
    %7 = arith.cmpi eq, %arg0, %c0_i32_1 : i32
    %8 = arith.extui %7 : i1 to i32
    %c0_i32_2 = arith.constant 0 : i32
    %9 = arith.cmpi ne, %8, %c0_i32_2 : i32
    scf.if %9 {
      %c0 = arith.constant 0 : index
      %c0_3 = arith.constant 0 : index
      %10 = vector.load %arg7[%c0, %c0_3] : memref<8x128xf32, #tpu.memory_space<vmem>>, vector<8x128xf32>
      %c0_4 = arith.constant 0 : index
      %c0_5 = arith.constant 0 : index
      %11 = vector.load %arg6[%c0_4, %c0_5] : memref<8x128xf32, #tpu.memory_space<vmem>>, vector<8x128xf32>
      tpu.vector_store %arg6[%c0_4, %c0_5], %10 {strides = array<i32>} : memref<8x128xf32, #tpu.memory_space<vmem>>, vector<8x128xf32>,
    } else {
    }
    return
  }
  func.func @transform_0(%arg0: i32, %arg1: memref<16xi32, #tpu.memory_space<smem>>) -> (i32, i32, i32) {
    %c0_i32 = arith.constant 0 : i32
    %c0_i32_0 = arith.constant 0 : i32
    %c0_i32_1 = arith.constant 0 : i32
    %c0_i32_2 = arith.constant 0 : i32
    return %c0_i32, %c0_i32_0, %c0_i32_1 : i32, i32, i32
  }
  func.func @transform_1(%arg0: i32, %arg1: memref<16xi32, #tpu.memory_space<smem>>) -> (i32, i32, i32) {
    %c0_i32 = arith.constant 0 : i32
    %c0_i32_0 = arith.constant 0 : i32
    %c0_i32_1 = arith.constant 0 : i32
    %c0_i32_2 = arith.constant 0 : i32
    return %c0_i32, %c0_i32_0, %c0_i32_1 : i32, i32, i32
  }
  func.func @transform_2(%arg0: i32, %arg1: memref<16xi32, #tpu.memory_space<smem>>) -> (i32, i32) {
    %c0_i32 = arith.constant 0 : i32
    %c0_i32_0 = arith.constant 0 : i32
    %c0_i32_1 = arith.constant 0 : i32
    return %c0_i32, %c0_i32_0 : i32, i32
  }
  func.func @transform_3(%arg0: i32, %arg1: memref<16xi32, #tpu.memory_space<smem>>) -> (i32, i32) {
    %c0_i32 = arith.constant 0 : i32
    %c0_i32_0 = arith.constant 0 : i32
    return %arg0, %c0_i32 : i32, i32
  }
  func.func @transform_4(%arg0: i32, %arg1: memref<16xi32, #tpu.memory_space<smem>>) -> (i32, i32) {
    %c0_i32 = arith.constant 0 : i32
    %c0_i32_0 = arith.constant 0 : i32
    %c0_i32_1 = arith.constant 0 : i32
    return %c0_i32, %c0_i32_0 : i32, i32
  }
}

</mosaic_0001>

<bundles_post_ra>
// kernel: tpu_custom_call.1
= control target key start
LH: loop header
LB: loop body
LE: loop exit
PB: predicated region body
PF: predicated region fallthrough
CT: control target
= control target key end

     0   :  { %s1087_s0 = inlined_call_operand.hbm [shape: s32[16], index: 0, kind: input, shape index: {}]   ;;  %s1088_s1 = inlined_call_operand.hbm [shape: f32[6,8,128], index: 1, kind: input, shape index: {}]   ;;  %s1089_s2 = inlined_call_operand.hbm [shape: f32[6,8,128], index: 2, kind: input, shape index: {}]   ;;  %s1090_s3 = inlined_call_operand.vmem [shape: f32[1,128], index: 3, kind: input, shape index: {}]   ;;  %s1091_s4 = inlined_call_operand.hbm [shape: s32[16,128], index: 4, kind: output, shape index: {0}]   ;;  %s1092_s5 = inlined_call_operand.hbm [shape: f32[8,128], index: 5, kind: output, shape index: {1}]  }
   0x1   :  { %s818_s20 = scalar_lea.hbm %s1087_s0, 16 }
   0x2   :  { %p819_p0 = scmp.ne.s32.totalorder %s1087_s0, %s818_s20  ;;  %p822_p1 = scmp.lt.u32.totalorder %s818_s20, %s1087_s0 }
   0x4   :  { %p824_p2 = pnand %p822_p1, %p819_p0 }
   0x6   :  { %827 = shalt.err (!%p824_p2)  }
   0x7   :  { %s926_s25 = smov [#allocation4]  }
   0x8   :  { %12 = dma.hbm_to_smem %s1087_s0, 16, %s926_s25, [#allocation3] }
   0x9   :  { %916 = dma.done.wait [#allocation3], 16 }
   0xa   :  { %917 = vsyncadd [#allocation3], 4294967280 }
   0xb   :  { %14 = sfence }
   0xc   :  { %15 = vsyncpa [#allocation6], 0 }
   0xd   :  { %16 = vsyncpa [#allocation9], 0 }
   0xe   :  { %17 = vsyncpa [#allocation7], 0 }
   0xf   :  { %18 = vsyncpa [#allocation12], 0  ;;  %s927_s28 = smov [#allocation5]   ;;  %s828_s7 = scalar_lea.hbm %s1088_s1, 768 }
  0x10   :  { %s24_s29 = sshll.u32 %s927_s28, 4  ;;  %p829_p3 = scmp.ne.s32.totalorder %s1088_s1, %s828_s7  ;;  %s25_s29 = int_to_ptr.vmem [resolvable:$true] %s24_s29 }
  0x11   :  { %p832_p4 = scmp.lt.u32.totalorder %s828_s7, %s1088_s1 }
  0x13   :  { %p834_p5 = pnand %p832_p4, %p829_p3 }
  0x15   :  { %837 = shalt.err (!%p834_p5)
}
  0x16   :  { %s838_s11 = scalar_lea.vmem %s25_s29, 768  ;;  %p843_p7 = scmp.lt.s32.totalorder %s25_s29, %s25_s29 }
  0x17   :  { %p839_p6 = scmp.ne.s32.totalorder %s25_s29, %s838_s11  ;;  %p844_p8 = scmp.lt.s32.totalorder %s838_s11, %s838_s11 }
  0x19   :  { %p845_p9 = por %p844_p8, %p843_p7 }
  0x1b   :  { %p846_p10 = pnand %p845_p9, %p839_p6 }
  0x1d   :  { %849 = shalt.err (!%p846_p10)
}
  0x1e   :  { %s928_s12 = smov 128   ;;  %s929_s13 = smov 8  }
  0x1f   :  { %30 = dma.hbm_to_vmem [thread:$0]  %s1088_s1, 768, %s25_s29, [#allocation6], %s928_s12, %s928_s12, %s929_s13  }
  0x20   :  { %s930_s16 = smov [#allocation8]   ;;  %s850_s20 = scalar_lea.hbm %s1089_s2, 768 }
  0x21   :  { %s36_s17 = sshll.u32 %s930_s16, 4  ;;  %p851_p11 = scmp.ne.s32.totalorder %s1089_s2, %s850_s20  ;;  %s37_s17 = int_to_ptr.vmem [resolvable:$true] %s36_s17 }
  0x22   :  { %p854_p12 = scmp.lt.u32.totalorder %s850_s20, %s1089_s2 }
  0x24   :  { %p856_p13 = pnand %p854_p12, %p851_p11 }
  0x26   :  { %859 = shalt.err (!%p856_p13)
}
  0x27   :  { %s860_s25 = scalar_lea.vmem %s37_s17, 768  ;;  %p865_p1 = scmp.lt.s32.totalorder %s37_s17, %s37_s17 }
  0x28   :  { %p861_p0 = scmp.ne.s32.totalorder %s37_s17, %s860_s25  ;;  %p866_p2 = scmp.lt.s32.totalorder %s860_s25, %s860_s25 }
  0x2a   :  { %p867_p3 = por %p866_p2, %p865_p1 }
  0x2c   :  { %p868_p4 = pnand %p867_p3, %p861_p0 }
  0x2e   :  { %871 = shalt.err (!%p868_p4)
}
  0x2f   :  { %42 = dma.hbm_to_vmem [thread:$0]  %s1089_s2, 768, %s37_s17, [#allocation9], %s928_s12, %s928_s12, %s929_s13  }
  0x30   :  { %918 = dma.done.wait [#allocation6], 768  }
  0x31   :  { %919 = vsyncadd [#allocation6], 4294966528 }
  0x32   :  { %920 = dma.done.wait [#allocation9], 768  }
  0x33   :  { %921 = vsyncadd [#allocation9], 4294966528  ;;  %s780_s27 = sld [smem:[#allocation4 + $0x1]]  ;;  %v778_v0 = vld [vmem:[%s1090_s3] ss:$0 sm:$0xff]  ;;  %s782_s7 = sld [smem:[#allocation4 + $0x2]]  ;;  %v51_v7 = vlaneseq }
  0x34   :  { %s784_s10 = sld [smem:[#allocation4 + $0x3]]  ;;  %s786_s0 = sld [smem:[#allocation4 + $0x4]] }
  0x35   :  { %v1009_v10 = vand.u32 127, %v51_v7  ;;  %v1011_v13 = vshrl.u32 %v51_v7, 7  ;;  %s788_s15 = sld [smem:[#allocation4 + $0x5]]  ;;  %s790_s18 = sld [smem:[#allocation4 + $0x6]] }
  0x36   :  { %s792_s21 = sld [smem:[#allocation4 + $0x7]]  ;;  %s931_s24 = smov [#allocation11]  }
  0x37   :  { %vm55_vm9 = vcmp.eq.s32.totalorder %v1009_v10, %v1011_v13  ;;  %vm215_vm14 = vcmp.eq.s32.totalorder %v1011_v13, 1  ;;  %vm246_vm15 = vcmp.eq.s32.totalorder %v1011_v13, 2  ;;  %s732_s25 = sshll.u32 %s931_s24, 4  ;;  %s733_s25 = int_to_ptr.vmem [resolvable:$true] %s732_s25 }
  0x38   :  { %s872_s1 = scalar_lea.vmem %s733_s25, 128  ;;  %p877_p6 = scmp.lt.s32.totalorder %s733_s25, %s733_s25 }
  0x39   :  { %s781_s30 = sshll.u32 %s780_s27, 3  ;;  %s783_s8 = sshll.u32 %s782_s7, 3 }
  0x3a   :  { %s77_s6 = scalar_lea.vmem [#allocation5], %s781_s30  ;;  %s82_s9 = scalar_lea.vmem [#allocation8], %s783_s8 }
  0x3b   :  { %v78_v1 = vld [vmem:[%s77_s6] sm:$0xff]  ;;  %s785_s2 = sshll.u32 %s784_s10, 3  ;;  %s787_s11 = sshll.u32 %s786_s0, 3 }
  0x3c   :  { %v180_v2 = vadd.f32 %v778_v0, %v78_v1  ;;  %v83_v3 = vld [vmem:[%s82_s9] sm:$0xff]  ;;  %s87_s3 = scalar_lea.vmem [#allocation5], %s785_s2  ;;  %s92_s14 = scalar_lea.vmem [#allocation8], %s787_s11 }
  0x3d   :  { %v88_v15 = vld [vmem:[%s87_s3] sm:$0xff]  ;;  %s789_s16 = sshll.u32 %s788_s15, 3  ;;  %s791_s19 = sshll.u32 %s790_s18, 3 }
  0x3e   :  { %181 = vmax.xlane.f32.xlu0 %v180_v2  ;;  %v93_v21 = vld [vmem:[%s92_s14] sm:$0xff]  ;;  %s97_s17 = scalar_lea.vmem [#allocation5], %s789_s16  ;;  %s102_s20 = scalar_lea.vmem [#allocation8], %s791_s19 }
  0x3f   :  { %v98_v29 = vld [vmem:[%s97_s17] sm:$0xff]  ;;  %s793_s22 = sshll.u32 %s792_s21, 3  ;;  %p873_p5 = scmp.ne.s32.totalorder %s733_s25, %s872_s1 }
  0x40   :  { %v103_v33 = vld [vmem:[%s102_s20] sm:$0xff]  ;;  %s107_s23 = scalar_lea.vmem [#allocation5], %s793_s22  ;;  %p878_p7 = scmp.lt.s32.totalorder %s872_s1, %s872_s1 }
  0x41   :  { %v108_v49 = vld [vmem:[%s107_s23] sm:$0xff] }
  0x42   :  { %p879_p8 = por %p878_p7, %p877_p6 }
  0x44   :  { %p880_p9 = pnand %p879_p8, %p873_p5 }
  0xcb   :  { %v182_v4 = vpop.xlane.xlu0 %181 }
  0xcc   :  { %v219_v5 = vadd.f32 %v182_v4, %v83_v3  ;;  %vm183_vm0 = vcmp.eq.f32.partialorder %v180_v2, %v182_v4 }
  0xcd   :  { %v184_v14 = vsel %vm183_vm0, %v1009_v10, 128 }
  0xce   :  { %v220_v6 = vrot.slane %v219_v5, 4  ;;  %v186_v18 = vshra.s32 %v184_v14, 16  ;;  %v185_v40 = vand.u32 65535, %v184_v14 }
  0xd0   :  { %v221_v8 = vmax.f32 %v219_v5, %v220_v6  ;;  %v188_v20 = vcvt.s32.f32 %v186_v18  ;;  %v187_v44 = vcvt.s32.f32 %v185_v40 }
  0xd2   :  { %v222_v9 = vrot.slane %v221_v8, 2 }
  0xd4   :  { %v223_v11 = vmax.f32 %v221_v8, %v222_v9 }
  0xd6   :  { %v224_v12 = vrot.slane %v223_v11, 1 }
  0xd8   :  { %v225_v16 = vmax.f32 %v223_v11, %v224_v12 }
  0xda   :  { %v250_v17 = vadd.f32 %v225_v16, %v88_v15  ;;  %vm226_vm1 = vcmp.eq.f32.partialorder %v219_v5, %v225_v16 }
  0xdb   :  { %v1015_v19 = vsel %vm226_vm1, %v1011_v13, 8 }
  0xdc   :  { %251 = vmax.xlane.f32.xlu0 %v250_v17  ;;  %v228_v55 = vrot.slane %v1015_v19, 4 }
  0xde   :  { %vm229_vm7 = vcmp.lt.s32.totalorder %v1015_v19, %v228_v55 }
  0xdf   :  { %v230_v60 = vsel %vm229_vm7, %v1015_v19, %v228_v55  ;;  %vm316_vm7 = vcmp.eq.s32.totalorder %v1011_v13, 4 }
  0xe0   :  { %189 = vmin.xlane.f32.xlu0 %v188_v20  ;;  %v231_v63 = vrot.slane %v230_v60, 2 }
  0xe2   :  { %vm232_vm10 = vcmp.lt.s32.totalorder %v230_v60, %v231_v63 }
  0xe3   :  { %v233_v6 = vsel %vm232_vm10, %v230_v60, %v231_v63 }
  0xe4   :  { %v234_v15 = vrot.slane %v233_v6, 1 }
  0xe6   :  { %vm235_vm13 = vcmp.lt.s32.totalorder %v233_v6, %v234_v15 }
 0x169   :  { %v252_v22 = vpop.xlane.xlu0 %251 }
 0x16a   :  { %v289_v23 = vadd.f32 %v252_v22, %v93_v21  ;;  %vm253_vm5 = vcmp.eq.f32.partialorder %v250_v17, %v252_v22  ;;  %v236_v22 = vsel %vm235_vm13, %v233_v6, %v234_v15 }
 0x16b   :  { %v254_v48 = vsel %vm253_vm5, %v1009_v10, 128 }
 0x16c   :  { %v290_v24 = vrot.slane %v289_v23, 4  ;;  %v256_v52 = vshra.s32 %v254_v48, 16  ;;  %v255_v14 = vand.u32 65535, %v254_v48 }
 0x16d   :  { %v190_v39 = vpop.xlane.xlu0 %189 }
 0x16e   :  { %v291_v25 = vmax.f32 %v289_v23, %v290_v24  ;;  %vm191_vm4 = vcmp.eq.f32.partialorder %v188_v20, %v190_v39  ;;  %v258_v54 = vcvt.s32.f32 %v256_v52  ;;  %v196_v59 = vcvt.f32.s32 %v190_v39 }
 0x16f   :  { %v192_v46 = vsel %vm191_vm4, %v187_v44, inf  ;;  %v257_v19 = vcvt.s32.f32 %v255_v14 }
 0x170   :  { %v292_v26 = vrot.slane %v291_v25, 2  ;;  %v197_v0 = vshll.u32 %v196_v59, 16 }
 0x172   :  { %v293_v27 = vmax.f32 %v291_v25, %v292_v26 }
 0x174   :  { %v294_v28 = vrot.slane %v293_v27, 1 }
 0x176   :  { %v295_v30 = vmax.f32 %v293_v27, %v294_v28 }
 0x178   :  { %v320_v31 = vadd.f32 %v295_v30, %v98_v29  ;;  %vm296_vm2 = vcmp.eq.f32.partialorder %v289_v23, %v295_v30 }
 0x179   :  { %v1018_v32 = vsel %vm296_vm2, %v1011_v13, 8 }
 0x17a   :  { %321 = vmax.xlane.f32.xlu1 %v320_v31 }
 0x207   :  { %v322_v34 = vpop.xlane.xlu1 %321 }
 0x208   :  { %vm323_vm3 = vcmp.eq.f32.partialorder %v320_v31, %v322_v34  ;;  %v359_v35 = vadd.f32 %v322_v34, %v103_v33  ;;  %v298_v31 = vrot.slane %v1018_v32, 4 }
 0x209   :  { %v324_v36 = vsel %vm323_vm3, %v1009_v10, 128 }
 0x20a   :  { %v360_v37 = vrot.slane %v359_v35, 4  ;;  %v326_v38 = vshra.s32 %v324_v36, 16  ;;  %v325_v56 = vand.u32 65535, %v324_v36  ;;  %vm299_vm0 = vcmp.lt.s32.totalorder %v1018_v32, %v298_v31 }
 0x20c   :  { %v361_v41 = vmax.f32 %v359_v35, %v360_v37  ;;  %v328_v42 = vcvt.s32.f32 %v326_v38  ;;  %v327_v58 = vcvt.s32.f32 %v325_v56  ;;  %v300_v38 = vsel %vm299_vm0, %v1018_v32, %v298_v31 }
 0x20e   :  { %329 = vmin.xlane.f32.xlu0 %v328_v42  ;;  %v362_v43 = vrot.slane %v361_v41, 2 }
 0x210   :  { %v363_v45 = vmax.f32 %v361_v41, %v362_v43  ;;  %v301_v43 = vrot.slane %v300_v38, 2 }
 0x212   :  { %193 = vmin.xlane.f32.xlu0 %v192_v46  ;;  %v364_v47 = vrot.slane %v363_v45, 1  ;;  %vm302_vm3 = vcmp.lt.s32.totalorder %v300_v38, %v301_v43 }
 0x213   :  { %v303_v32 = vsel %vm302_vm3, %v300_v38, %v301_v43 }
 0x214   :  { %v365_v50 = vmax.f32 %v363_v45, %v364_v47  ;;  %v304_v56 = vrot.slane %v303_v32, 1 }
 0x216   :  { %v390_v51 = vadd.f32 %v365_v50, %v108_v49  ;;  %vm366_vm6 = vcmp.eq.f32.partialorder %v359_v35, %v365_v50  ;;  %vm305_vm5 = vcmp.lt.s32.totalorder %v303_v32, %v304_v56 }
 0x217   :  { %v1023_v53 = vsel %vm366_vm6, %v1011_v13, 8  ;;  %vm285_vm6 = vcmp.eq.s32.totalorder %v1011_v13, 3 }
 0x218   :  { %391 = vmax.xlane.f32.xlu1 %v390_v51  ;;  %v368_v34 = vrot.slane %v1023_v53, 4 }
 0x21a   :  { %vm369_vm1 = vcmp.lt.s32.totalorder %v1023_v53, %v368_v34 }
 0x21b   :  { %v370_v41 = vsel %vm369_vm1, %v1023_v53, %v368_v34 }
 0x21c   :  { %259 = vmin.xlane.f32.xlu1 %v258_v54  ;;  %v371_v47 = vrot.slane %v370_v41, 2 }
 0x21e   :  { %vm372_vm4 = vcmp.lt.s32.totalorder %v370_v41, %v371_v47 }
 0x29b   :  { %v330_v57 = vpop.xlane.xlu0 %329 }
 0x29c   :  { %vm331_vm8 = vcmp.eq.f32.partialorder %v328_v42, %v330_v57  ;;  %v336_v25 = vcvt.f32.s32 %v330_v57 }
 0x29d   :  { %v332_v61 = vsel %vm331_vm8, %v327_v58, inf  ;;  %vm355_vm8 = vcmp.eq.s32.totalorder %v1011_v13, 5 }
 0x29e   :  { %333 = vmin.xlane.f32.xlu0 %v332_v61  ;;  %v337_v27 = vshll.u32 %v336_v25, 16 }
 0x29f   :  { %v194_v62 = vpop.xlane.xlu0 %193 }
 0x2a0   :  { %v195_v1 = vcvt.f32.s32 %v194_v62  ;;  %v306_v62 = vsel %vm305_vm5, %v303_v32, %v304_v56 }
 0x2a2   :  { %v198_v2 = vadd.s32 %v197_v0, %v195_v1 }
 0x2a4   :  { %v199_v3 = vsel %vm55_vm9, %v198_v2, 0 }
 0x2a5   :  { %v200_v4 = vrot.slane %v199_v3, 4  ;;  %v392_v5 = vpop.xlane.xlu1 %391 }
 0x2a6   :  { %vm393_vm11 = vcmp.eq.f32.partialorder %v390_v51, %v392_v5  ;;  %713 = vst [vmem:[#allocation11] sm:$0xff] %v392_v5  ;;  %v932_v5 = vmov 0  }
 0x2a7   :  { %v201_v7 = vadd.s32 %v200_v4, %v199_v3  ;;  %v394_v8 = vsel %vm393_vm11, %v1009_v10, 128  ;;  %vm386_vm11 = vcmp.eq.s32.totalorder %v1011_v13, 6  ;;  %710 = vst [vmem:[#allocation10 + $0x8] sm:$0xff] %v932_v5 }
 0x2a8   :  { %v396_v9 = vshra.s32 %v394_v8, 16  ;;  %v395_v33 = vand.u32 65535, %v394_v8 }
 0x2a9   :  { %v202_v11 = vrot.slane %v201_v7, 2  ;;  %v260_v12 = vpop.xlane.xlu1 %259 }
 0x2aa   :  { %v398_v16 = vcvt.s32.f32 %v396_v9  ;;  %vm261_vm12 = vcmp.eq.f32.partialorder %v258_v54, %v260_v12  ;;  %v397_v36 = vcvt.s32.f32 %v395_v33  ;;  %v266_v37 = vcvt.f32.s32 %v260_v12 }
 0x2ab   :  { %v203_v17 = vadd.s32 %v202_v11, %v201_v7  ;;  %v262_v21 = vsel %vm261_vm12, %v257_v19, inf  ;;  %v373_v54 = vsel %vm372_vm4, %v370_v41, %v371_v47 }
 0x2ac   :  { %399 = vmin.xlane.f32.xlu1 %v398_v16  ;;  %v267_v44 = vshll.u32 %v266_v37, 16  ;;  %v374_v58 = vrot.slane %v373_v54, 1 }
 0x2ad   :  { %v204_v18 = vrot.slane %v203_v17, 1 }
 0x2ae   :  { %vm375_vm10 = vcmp.lt.s32.totalorder %v373_v54, %v374_v58 }
 0x2af   :  { %v205_v20 = vadd.s32 %v204_v18, %v203_v17  ;;  %v376_v3 = vsel %vm375_vm10, %v373_v54, %v374_v58 }
 0x2b0   :  { %263 = vmin.xlane.f32.xlu1 %v262_v21 }
 0x2b1   :  { %v217_v23 = vsel %vm215_vm14, %v205_v20, 0 }
 0x2b2   :  { %v248_v24 = vsel %vm246_vm15, %v236_v22, %v217_v23 }
 0x32b   :  { %v334_v26 = vpop.xlane.xlu0 %333 }
 0x32c   :  { %v335_v28 = vcvt.f32.s32 %v334_v26 }
 0x32e   :  { %v338_v29 = vadd.s32 %v337_v27, %v335_v28 }
 0x330   :  { %v339_v30 = vsel %vm55_vm9, %v338_v29, 0 }
 0x331   :  { %v340_v39 = vrot.slane %v339_v30, 4 }
 0x333   :  { %v341_v46 = vadd.s32 %v340_v39, %v339_v30 }
 0x335   :  { %v342_v50 = vrot.slane %v341_v46, 2 }
 0x337   :  { %v343_v55 = vadd.s32 %v342_v50, %v341_v46 }
 0x339   :  { %v1042_v35 = vpop.xlane.xlu1 %399  ;;  %v344_v59 = vrot.slane %v343_v55, 1 }
 0x33a   :  { %vm401_vm2 = vcmp.eq.f32.partialorder %v398_v16, %v1042_v35 }
 0x33b   :  { %v402_v40 = vsel %vm401_vm2, %v397_v36, inf  ;;  %v345_v63 = vadd.s32 %v344_v59, %v343_v55 }
 0x33c   :  { %403 = vmin.xlane.f32.xlu1 %v402_v40 }
 0x33d   :  { %v264_v42 = vpop.xlane.xlu1 %263 }
 0x33e   :  { %v265_v45 = vcvt.f32.s32 %v264_v42 }
 0x340   :  { %v268_v48 = vadd.s32 %v267_v44, %v265_v45 }
 0x342   :  { %v269_v49 = vsel %vm55_vm9, %v268_v48, 0 }
 0x343   :  { %v270_v51 = vrot.slane %v269_v49, 4 }
 0x345   :  { %v271_v52 = vadd.s32 %v270_v51, %v269_v49 }
 0x347   :  { %v272_v53 = vrot.slane %v271_v52, 2 }
 0x349   :  { %v273_v57 = vadd.s32 %v272_v53, %v271_v52 }
 0x34b   :  { %v274_v60 = vrot.slane %v273_v57, 1 }
 0x34d   :  { %v275_v61 = vadd.s32 %v274_v60, %v273_v57 }
 0x34f   :  { %v287_v0 = vsel %vm285_vm6, %v275_v61, %v248_v24 }
 0x350   :  { %v318_v1 = vsel %vm316_vm7, %v306_v62, %v287_v0 }
 0x351   :  { %v357_v2 = vsel %vm355_vm8, %v345_v63, %v318_v1 }
 0x352   :  { %v388_v4 = vsel %vm386_vm11, %v376_v3, %v357_v2 }
 0x353   :  { %883 = shalt.err (!%p880_p9)
}
 0x354   :  { %s884_s28 = scalar_lea.hbm %s1092_s5, 128 }
 0x355   :  { %p885_p10 = scmp.ne.s32.totalorder %s1092_s5, %s884_s28  ;;  %p888_p11 = scmp.lt.u32.totalorder %s884_s28, %s1092_s5 }
 0x357   :  { %p890_p12 = pnand %p888_p11, %p885_p10 }
 0x359   :  { %893 = shalt.err (!%p890_p12)
}
 0x35a   :  { %735 = dma.vmem_to_hbm [thread:$0]  %s733_s25, 128, %s1092_s5, [#allocation12]   ;;  %v406_v6 = vcvt.f32.s32 %v1042_v35  ;;  %vm425_vm12 = vcmp.eq.s32.totalorder %v1011_v13, 7 }
 0x35b   :  { %s933_s10 = smov [#allocation10]  }
 0x35c   :  { %v407_v8 = vshll.u32 %v406_v6, 16  ;;  %s719_s2 = sshll.u32 %s933_s10, 4  ;;  %s720_s2 = int_to_ptr.vmem [resolvable:$true] %s719_s2 }
 0x35d   :  { %s894_s5 = scalar_lea.vmem %s720_s2, 256  ;;  %p899_p0 = scmp.lt.s32.totalorder %s720_s2, %s720_s2 }
 0x35e   :  { %p895_p13 = scmp.ne.s32.totalorder %s720_s2, %s894_s5  ;;  %p900_p1 = scmp.lt.s32.totalorder %s894_s5, %s894_s5 }
 0x360   :  { %p901_p2 = por %p900_p1, %p899_p0 }
 0x362   :  { %p902_p3 = pnand %p901_p2, %p895_p13 }
 0x3c9   :  { %v404_v7 = vpop.xlane.xlu1 %403 }
 0x3ca   :  { %v405_v9 = vcvt.f32.s32 %v404_v7 }
 0x3cc   :  { %v408_v11 = vadd.s32 %v407_v8, %v405_v9 }
 0x3ce   :  { %v409_v12 = vsel %vm55_vm9, %v408_v11, 0 }
 0x3cf   :  { %v410_v14 = vrot.slane %v409_v12, 4 }
 0x3d1   :  { %v411_v15 = vadd.s32 %v410_v14, %v409_v12 }
 0x3d3   :  { %v412_v16 = vrot.slane %v411_v15, 2 }
 0x3d5   :  { %v413_v17 = vadd.s32 %v412_v16, %v411_v15 }
 0x3d7   :  { %v414_v18 = vrot.slane %v413_v17, 1 }
 0x3d9   :  { %v415_v19 = vadd.s32 %v414_v18, %v413_v17 }
 0x3db   :  { %v427_v20 = vsel %vm425_vm12, %v415_v19, %v388_v4 }
 0x3dc   :  { %709 = vst [vmem:[#allocation10] sm:$0xff] %v427_v20 }
 0x3dd   :  { %905 = shalt.err (!%p902_p3)
}
 0x3de   :  { %s906_s11 = scalar_lea.hbm %s1091_s4, 256 }
 0x3df   :  { %p907_p4 = scmp.ne.s32.totalorder %s1091_s4, %s906_s11  ;;  %p910_p5 = scmp.lt.u32.totalorder %s906_s11, %s1091_s4 }
 0x3e1   :  { %p912_p6 = pnand %p910_p5, %p907_p4 }
 0x3e3   :  { %915 = shalt.err (!%p912_p6)
}
 0x3e4   :  { %725 = dma.vmem_to_hbm [thread:$0]  %s720_s2, 256, %s1091_s4, [#allocation7], %s928_s12, %s928_s12, %s929_s13  }
 0x3e5   :  { %922 = dma.done.wait [#allocation7], 256  }
 0x3e6   :  { %923 = vsyncadd [#allocation7], 4294967040 }
 0x3e7   :  { %924 = dma.done.wait [#allocation12], 128  }
 0x3e8   :  { %925 = vsyncadd [#allocation12], 4294967168 }
 0x3e9   :  { %742 = vsyncpa [#allocation6], 1 }
 0x3ea   :  { %743 = vsyncpa [#allocation9], 1 }
 0x3eb   :  { %744 = vsyncpa [#allocation7], 1 }
 0x3ec   :  { %745 = vsyncpa [#allocation12], 1 }

</bundles_post_ra>
